<compile_context>
chip_gen: v6e
topology: v6e:2x2x1
jax: 0.10.0
libtpu: 0.0.40
codegen_flags: <defaults>
</compile_context>

<pallas_src>
import functools

import jax
import jax.numpy as jnp
from jax.experimental import pallas as pl
from jax.experimental.pallas import tpu as pltpu


def _pair(v):
    return (v, v) if isinstance(v, int) else tuple(v)


def _cdiv(a, b):
    return -(-a // b)


def _round_up(a, b):
    return _cdiv(a, b) * b


def _vmem_limit_bytes():
    """Scoped-VMEM limit per generation: ~75% of physical, capped at 100 MiB.

    v5e/v6e (128 MiB physical) -> ~96 MiB; v7x (64 MiB physical) -> 48 MiB.
    """
    phys = None
    try:
        phys = getattr(pltpu.get_tpu_info(), "vmem_capacity_bytes", None)
    except Exception:
        phys = None
    if not phys:
        phys = 64 * 1024 * 1024  # conservative default (v7x physical VMEM)
    return int(min(100 * 1024 * 1024, phys * 3 // 4))


def _adapool2d_kernel(x_ref, beta_ref, o_ref, *, kH, kW, sH, sW, C, approx_recip):
    """One (batch, output-row band) tile per grid step.

    x_ref:    (1, 1, T_oh + QH, sH, GW, sW*C)  input dtype (banded stride-grouped NHWC view)
    beta_ref: (1, T_oh, oW, 1)                 float32
    o_ref:    (1, T_oh, oW, C)                 output dtype
    """
    _, T_oh, oW, _ = o_ref.shape
    inv_n = 1.0 / float(kH * kW)

    def band(kh):
        qh, rh = divmod(kh, sH)
        # One contiguous row band per kh; re-read from the VMEM ref (cheap vld traffic)
        # instead of keeping slabs live, and cast to f32 in vregs.
        return x_ref[0, 0, qh:qh + T_oh, rh, :, :].astype(jnp.float32)   # (T_oh, GW, sW*C)

    def slab(b, kw):
        qw, rw = divmod(kw, sW)
        return b[:, qw:qw + oW, rw * C:(rw + 1) * C]                     # (T_oh, oW, C)

    # Pass 1: window mean.  Only `mean` stays live between the two passes (keeping all
    # kH*kW float32 slabs live was the previous VMEM/vreg ceiling).
    mean = None
    for kh in range(kH):
        b = band(kh)
        for kw in range(kW):
            s = slab(b, kw)
            mean = s if mean is None else mean + s
    mean = mean * inv_n
    mean_sq = mean * mean      # loop-invariant, hoisted
    two_mean = mean + mean     # loop-invariant, hoisted

    # Pass 2: weighted accumulation, re-sliced directly from the VMEM ref.
    em_num = em_den = ed_num = ed_den = None
    for kh in range(kH):
        b = band(kh)
        for kw in range(kW):
            s = slab(b, kw)
            e_em = jnp.exp(s)                                   # eM / SoftPool weight (EUP)
            den = s * s + mean_sq
            if approx_recip:
                dsc = (two_mean * s) * pl.reciprocal(den, approx=True)
            else:
                dsc = (two_mean * s) / den                      # Dice-Sorensen coefficient
            e_ed = jnp.exp(dsc)                                 # eDSCW weight (EUP)
            if em_num is None:
                em_num, em_den = e_em * s, e_em
                ed_num, ed_den = e_ed * s, e_ed
            else:
                em_num = em_num + e_em * s
                em_den = em_den + e_em
                ed_num = ed_num + e_ed * s
                ed_den = ed_den + e_ed

    # All three nan_to_num are kept for exact parity with the PyTorch forward (each CUDA
    # sub-pool nan_to_nums its own output before the blend).  Dropping the inner two saves a
    # little VALU work but changes +/-inf edge cases, so it is intentionally not done.
    if approx_recip:
        em = jnp.nan_to_num(em_num * pl.reciprocal(em_den, approx=True))
        ed = jnp.nan_to_num(ed_num * pl.reciprocal(ed_den, approx=True))
    else:
        em = jnp.nan_to_num(em_num / em_den)
        ed = jnp.nan_to_num(ed_num / ed_den)

    beta = beta_ref[0]                                          # (T_oh, oW, 1) float32
    out = jnp.nan_to_num(beta * ed + (1.0 - beta) * em)         # (T_oh, oW, C)
    o_ref[0] = out.astype(o_ref.dtype)


def adapool2d_nhwc(x, beta, kernel_size=2, stride=None, *,
                   out_dtype=jnp.float32, approx_recip=False):
    """AdaPool2d on a channels-last tensor: (B, H, W, C) -> (B, oH, oW, C).

    Transpose-free fast path (channels stay on the lane axis); `adapool2d` wraps it for the
    PyTorch NCHW layout.  `out_dtype=jnp.bfloat16` is an opt-in HBM-traffic saving for
    memory-bound parts (PyTorch semantics are float32); `approx_recip=True` swaps the exact
    divides for EUP approximate reciprocals (useful in the EUP-bound v7x / bf16-v6e regime).
    """
    if stride is None:
        stride = kernel_size
    kH, kW = _pair(kernel_size)
    sH, sW = _pair(stride)

    B, H, W, C = x.shape
    oH = (H - kH) // sH + 1
    oW = (W - kW) // sW + 1
    assert oH >= 1 and oW >= 1, "pooling window larger than input"

    beta = jnp.asarray(beta, jnp.float32)
    if beta.shape == (1, 1):
        beta = jnp.broadcast_to(beta, (oH, oW))
    assert beta.shape == (oH, oW), (
        f"Required `beta` shape {(oH, oW)} does not match given shape {tuple(beta.shape)}")

    # ---- Stride-grouped, band-tiled channels-last view --------------------------------
    # TODO(synk): for C not a multiple of 128 the per-window lane slice and the (..., C)
    # output stores are sub-vreg; a lane-dense repack (folding oW*C onto the lane axis) is
    # future work.  When C % 128 == 0 every slice/store is vreg-aligned.
    QH, QW = (kH - 1) // sH, (kW - 1) // sW      # halo in grouped rows / cols
    GW = oW + QW

    in_isz = jnp.dtype(x.dtype).itemsize
    out_isz = jnp.dtype(out_dtype).itemsize

    # Per-output-row VMEM footprint: double-buffered input/output/beta blocks plus the live
    # float32 temporaries of the kernel (mean, 4 accumulators, one f32 band, transients).
    row_in = sH * GW * sW * C * in_isz
    halo_in = QH * sH * GW * sW * C * in_isz
    row_out = oW * C * out_isz
    row_beta = _round_up(oW, 8) * 128 * 4        # size-1 lane dim pads to a full 128-lane vreg
    row_tmp = 12 * oW * C * 4
    row_total = 2 * (row_in + row_out + row_beta) + row_tmp

    vmem_limit = _vmem_limit_bytes()
    budget = int(vmem_limit * 0.45)              # leave >half the limit for compiler scratch/spill
    t_budget = max(1, (budget - 2 * halo_in) // row_total)
    t_dma = max(1, (4 * (1 << 20) - halo_in) // row_in)   # ~4 MiB input band: roofline sweet spot
    T_oh = max(1, min(oH, t_budget, t_dma))
    if B == 1 and oH >= 2:
        # Guarantee >= 2 bands so both v7x TensorCores get work (harmless on 1-TC chips).
        T_oh = min(T_oh, _cdiv(oH, 2))
    nT = _cdiv(oH, T_oh)                         # ragged last band: no divisor cliff for prime oH
    oH_pad = nT * T_oh

    GH_pad = oH_pad + QH
    Hp, Wp = GH_pad * sH, GW * sW
    xg = x[:, :min(H, Hp), :min(W, Wp), :]
    pad_h, pad_w = Hp - xg.shape[1], Wp - xg.shape[2]
    if pad_h > 0 or pad_w > 0:
        xg = jnp.pad(xg, ((0, 0), (0, max(0, pad_h)), (0, max(0, pad_w)), (0, 0)))
    xg = xg.reshape(B, GH_pad, sH, GW, sW * C)   # free (row-major) reshape; original dtype

    if QH == 0:
        xb = xg.reshape(B, nT, T_oh, sH, GW, sW * C)          # free: non-overlapping bands
    else:
        # Haloed row bands for overlapping windows (kH > sH): materialize each band with its
        # QH-row halo so the per-band VMEM block stays bounded.  Costs one extra HBM copy of
        # x (~(1 + QH/T_oh)x) instead of the old whole-image-per-batch fallback that blew the
        # scoped-VMEM limit for realistic shapes.
        rows = jnp.arange(nT)[:, None] * T_oh + jnp.arange(T_oh + QH)[None, :]
        xb = jnp.take(xg, rows, axis=1)                        # (B, nT, T_oh+QH, sH, GW, sW*C)

    beta_b = jnp.pad(beta, ((0, oH_pad - oH), (0, 0))).reshape(nT, T_oh, oW, 1)

    n_win = kH * kW
    out_elems = B * oH_pad * oW * C
    cost = pl.CostEstimate(
        flops=int(out_elems * (12 * n_win + 12)),
        transcendentals=int(out_elems * 2 * n_win),
        bytes_accessed=int(xb.size * in_isz + out_elems * out_isz + beta_b.size * 4),
    )

    kernel = functools.partial(_adapool2d_kernel, kH=kH, kW=kW, sH=sH, sW=sW, C=C,
                               approx_recip=approx_recip)

    out = pl.pallas_call(
        kernel,
        out_shape=jax.ShapeDtypeStruct((B, oH_pad, oW, C), out_dtype),
        grid_spec=pltpu.PrefetchScalarGridSpec(
            num_scalar_prefetch=0,
            grid=(B, nT),
            in_specs=[
                pl.BlockSpec((1, 1, T_oh + QH, sH, GW, sW * C),
                             lambda b, t: (b, t, 0, 0, 0, 0)),
                # TODO(synk): a (nT, T_oh, oW) lane-dense beta block (+ in-kernel trailing
                # expand) would avoid the 128-lane padding of this size-1 lane dim; the 4-D
                # block is kept because it needs no in-kernel relayout and its padded size is
                # already charged to the T_oh budget above.
                pl.BlockSpec((1, T_oh, oW, 1), lambda b, t: (t, 0, 0, 0)),
            ],
            out_specs=pl.BlockSpec((1, T_oh, oW, C), lambda b, t: (b, t, 0, 0)),
        ),
        compiler_params=pltpu.CompilerParams(
            dimension_semantics=("parallel", "parallel"),
            vmem_limit_bytes=vmem_limit,
        ),
        cost_estimate=cost,
    )(xb, beta_b)

    return out[:, :oH] if oH_pad != oH else out


def adapool2d(x, beta=None, kernel_size=2, stride=None, return_mask=False, native=False,
              out_dtype=jnp.float32, approx_recip=False):
    """PyTorch-layout AdaPool2d: x (B, C, H, W) or (C, H, W) -> pooled output (float32).

    For performance-critical use call `adapool2d_nhwc` directly and keep activations
    channels-last; the NCHW<->NHWC transposes here exist only for PyTorch compatibility.
    """
    assert beta is not None, "Function called with `None`/undefined `beta` parameter."
    if return_mask:
        # TODO(synk): per-window softmax-weight mask outputs are not implemented.
        raise NotImplementedError("return_mask=True is not supported")
    no_batch = x.ndim == 3
    if no_batch:
        x = x[None]
    if native:
        beta = jnp.clip(jnp.asarray(beta, jnp.float32), 0.0, 1.0)
    out = adapool2d_nhwc(jnp.transpose(x, (0, 2, 3, 1)), beta,
                         kernel_size=kernel_size, stride=stride,
                         out_dtype=out_dtype, approx_recip=approx_recip)
    out = jnp.transpose(out, (0, 3, 1, 2))
    return out[0] if no_batch else out


class AdaPool2d:
    """JAX/Pallas analogue of the PyTorch AdaPool2d module (forward pass only)."""

    def __init__(self, kernel_size=2, beta=None, stride=None, beta_trainable=True,
                 return_mask=False, dtype=jnp.float32, native=False):
        if stride is None:
            stride = kernel_size
        self.kernel_size = _pair(kernel_size)
        self.stride = _pair(stride)
        self.native = native
        self.return_mask = return_mask
        assert isinstance(beta, tuple) or hasattr(beta, "shape"), (
            "`beta` must be a shape tuple (oH, oW) or an array of that shape")
        if isinstance(beta, tuple):
            beta = jax.random.normal(jax.random.PRNGKey(0), beta, dtype=dtype)
        self.beta = jnp.clip(jnp.asarray(beta, dtype), 0.0, 1.0)
        self.beta_trainable = beta_trainable  # TODO(synk): gradients / backward not implemented

    def __call__(self, x):
        return adapool2d(x, beta=self.beta, kernel_size=self.kernel_size,
                         stride=self.stride, return_mask=self.return_mask,
                         native=self.native)


def _ref_adapool2d(x, beta, kernel_size=2, stride=None):
    """Pure-JAX (XLA) reference for correctness checking, NCHW layout."""
    if stride is None:
        stride = kernel_size
    kH, kW = _pair(kernel_size)
    sH, sW = _pair(stride)
    B, C, H, W = x.shape
    oH = (H - kH) // sH + 1
    oW = (W - kW) // sW + 1
    x = x.astype(jnp.float32)
    wins = []
    for kh in range(kH):
        for kw in range(kW):
            wins.append(x[:, :, kh:kh + oH * sH:sH, kw:kw + oW * sW:sW])
    w = jnp.stack(wins, 0)                          # (kH*kW, B, C, oH, oW)
    mean = w.mean(0)
    e_em = jnp.exp(w)
    em = jnp.nan_to_num((e_em * w).sum(0) / e_em.sum(0))
    dsc = (2.0 * w * mean) / (w * w + mean * mean)
    e_ed = jnp.exp(dsc)
    ed = jnp.nan_to_num((e_ed * w).sum(0) / e_ed.sum(0))
    beta = jnp.asarray(beta, jnp.float32)
    if beta.shape == (1, 1):
        beta = jnp.broadcast_to(beta, (oH, oW))
    b = beta[None, None]
    return jnp.nan_to_num(b * ed + (1.0 - b) * em)


if __name__ == "__main__":
    key = jax.random.PRNGKey(0)
    kx, kb = jax.random.split(key)

    # Primary check: module-equivalent configuration (B=2, C=4, 16x16, kernel=stride=2).
    x = jax.random.normal(kx, (2, 4, 16, 16), dtype=jnp.float32)
    beta = jnp.clip(jax.random.normal(kb, (8, 8), dtype=jnp.float32), 0.0, 1.0)
    pool = AdaPool2d(kernel_size=2, beta=beta)
    out = jax.block_until_ready(pool(x))
    ref = _ref_adapool2d(x, beta, kernel_size=2)
    assert out.shape == (2, 4, 8, 8), out.shape
    assert jnp.allclose(out, ref, atol=1e-4, rtol=1e-4), "mismatch vs reference (k=2, s=2)"

    # Overlapping windows + non-divisible spatial dims (kernel=3, stride=2): exercises the
    # haloed-band path and the ragged (padded) last band.
    x2 = jax.random.normal(kx, (1, 4, 11, 13), dtype=jnp.float32)
    beta2 = jnp.clip(jax.random.normal(kb, (5, 6), dtype=jnp.float32), 0.0, 1.0)
    out2 = jax.block_until_ready(adapool2d(x2, beta2, kernel_size=3, stride=2))
    ref2 = _ref_adapool2d(x2, beta2, kernel_size=3, stride=2)
    assert out2.shape == (1, 4, 5, 6), out2.shape
    assert jnp.allclose(out2, ref2, atol=1e-4, rtol=1e-4), "mismatch vs reference (k=3, s=2)"

    # Non-overlapping windows with a ragged last band (B=1 forces >=2 bands, oH=9 odd).
    x3 = jax.random.normal(kx, (1, 4, 18, 18), dtype=jnp.float32)
    beta3 = jnp.clip(jax.random.normal(kb, (9, 9), dtype=jnp.float32), 0.0, 1.0)
    out3 = jax.block_until_ready(adapool2d(x3, beta3, kernel_size=2, stride=2))
    ref3 = _ref_adapool2d(x3, beta3, kernel_size=2, stride=2)
    assert out3.shape == (1, 4, 9, 9), out3.shape
    assert jnp.allclose(out3, ref3, atol=1e-4, rtol=1e-4), "mismatch vs reference (ragged band)"

    print("KERNEL_OK")
</pallas_src>

<mosaic_0001>
module attributes {stable_mosaic.version = 11 : i64} {
  func.func @_adapool2d_kernel(%arg0: i32, %arg1: i32, %arg2: memref<1x1x8x2x8x8xf32, #tpu.memory_space<vmem>>, %arg3: memref<1x8x8x1xf32, #tpu.memory_space<vmem>>, %arg4: memref<1x8x8x4xf32, #tpu.memory_space<vmem>>) attributes {dimension_semantics = [#tpu.dimension_semantics<parallel>, #tpu.dimension_semantics<parallel>], iteration_bounds = array<i64: 2, 1>, scalar_prefetch = 0 : i64, scratch_operands = 0 : i64, tpu.core_type = #tpu.core_type<tc>, window_params = [{transform_indices = @transform_0, window_bounds = array<i64: 1, 1, 8, 2, 8, 8>}, {transform_indices = @transform_1, window_bounds = array<i64: 1, 8, 8, 1>}, {transform_indices = @transform_2, window_bounds = array<i64: 1, 8, 8, 4>}]} {
    %c0 = arith.constant 0 : index
    %c0_0 = arith.constant 0 : index
    %c0_1 = arith.constant 0 : index
    %c0_2 = arith.constant 0 : index
    %c0_3 = arith.constant 0 : index
    %c0_4 = arith.constant 0 : index
    %0 = vector.load %arg2[%c0, %c0_0, %c0_1, %c0_2, %c0_3, %c0_4] : memref<1x1x8x2x8x8xf32, #tpu.memory_space<vmem>>, vector<1x1x8x1x8x8xf32>
    %1 = vector.shape_cast %0 : vector<1x1x8x1x8x8xf32> to vector<8x8x8xf32>
    %2 = vector.extract_strided_slice %1 {offsets = [0, 0, 0], sizes = [8, 8, 4], strides = [1, 1, 1]} : vector<8x8x8xf32> to vector<8x8x4xf32>
    %3 = vector.extract_strided_slice %1 {offsets = [0, 0, 4], sizes = [8, 8, 4], strides = [1, 1, 1]} : vector<8x8x8xf32> to vector<8x8x4xf32>
    %4 = arith.addf %2, %3 : vector<8x8x4xf32>
    %c0_5 = arith.constant 0 : index
    %c0_6 = arith.constant 0 : index
    %c0_7 = arith.constant 0 : index
    %c1 = arith.constant 1 : index
    %c0_8 = arith.constant 0 : index
    %c0_9 = arith.constant 0 : index
    %5 = vector.load %arg2[%c0_5, %c0_6, %c0_7, %c1, %c0_8, %c0_9] : memref<1x1x8x2x8x8xf32, #tpu.memory_space<vmem>>, vector<1x1x8x1x8x8xf32>
    %6 = vector.shape_cast %5 : vector<1x1x8x1x8x8xf32> to vector<8x8x8xf32>
    %7 = vector.extract_strided_slice %6 {offsets = [0, 0, 0], sizes = [8, 8, 4], strides = [1, 1, 1]} : vector<8x8x8xf32> to vector<8x8x4xf32>
    %8 = arith.addf %4, %7 : vector<8x8x4xf32>
    %9 = vector.extract_strided_slice %6 {offsets = [0, 0, 4], sizes = [8, 8, 4], strides = [1, 1, 1]} : vector<8x8x8xf32> to vector<8x8x4xf32>
    %10 = arith.addf %8, %9 : vector<8x8x4xf32>
    %cst = arith.constant 2.500000e-01 : f32
    %11 = vector.broadcast %cst : f32 to vector<8x8x4xf32>
    %12 = arith.mulf %10, %11 : vector<8x8x4xf32>
    %13 = arith.mulf %12, %12 : vector<8x8x4xf32>
    %14 = arith.addf %12, %12 : vector<8x8x4xf32>
    %c0_10 = arith.constant 0 : index
    %c0_11 = arith.constant 0 : index
    %c0_12 = arith.constant 0 : index
    %c0_13 = arith.constant 0 : index
    %c0_14 = arith.constant 0 : index
    %c0_15 = arith.constant 0 : index
    %15 = vector.load %arg2[%c0_10, %c0_11, %c0_12, %c0_13, %c0_14, %c0_15] : memref<1x1x8x2x8x8xf32, #tpu.memory_space<vmem>>, vector<1x1x8x1x8x8xf32>
    %16 = vector.shape_cast %15 : vector<1x1x8x1x8x8xf32> to vector<8x8x8xf32>
    %17 = vector.extract_strided_slice %16 {offsets = [0, 0, 0], sizes = [8, 8, 4], strides = [1, 1, 1]} : vector<8x8x8xf32> to vector<8x8x4xf32>
    %18 = math.exp %17 : vector<8x8x4xf32>
    %19 = arith.mulf %17, %17 : vector<8x8x4xf32>
    %20 = arith.addf %19, %13 : vector<8x8x4xf32>
    %21 = arith.mulf %14, %17 : vector<8x8x4xf32>
    %22 = arith.divf %21, %20 : vector<8x8x4xf32>
    %23 = math.exp %22 : vector<8x8x4xf32>
    %24 = arith.mulf %18, %17 : vector<8x8x4xf32>
    %25 = arith.mulf %23, %17 : vector<8x8x4xf32>
    %26 = vector.extract_strided_slice %16 {offsets = [0, 0, 4], sizes = [8, 8, 4], strides = [1, 1, 1]} : vector<8x8x8xf32> to vector<8x8x4xf32>
    %27 = math.exp %26 : vector<8x8x4xf32>
    %28 = arith.mulf %26, %26 : vector<8x8x4xf32>
    %29 = arith.addf %28, %13 : vector<8x8x4xf32>
    %30 = arith.mulf %14, %26 : vector<8x8x4xf32>
    %31 = arith.divf %30, %29 : vector<8x8x4xf32>
    %32 = math.exp %31 : vector<8x8x4xf32>
    %33 = arith.mulf %27, %26 : vector<8x8x4xf32>
    %34 = arith.addf %24, %33 : vector<8x8x4xf32>
    %35 = arith.addf %18, %27 : vector<8x8x4xf32>
    %36 = arith.mulf %32, %26 : vector<8x8x4xf32>
    %37 = arith.addf %25, %36 : vector<8x8x4xf32>
    %38 = arith.addf %23, %32 : vector<8x8x4xf32>
    %c0_16 = arith.constant 0 : index
    %c0_17 = arith.constant 0 : index
    %c0_18 = arith.constant 0 : index
    %c1_19 = arith.constant 1 : index
    %c0_20 = arith.constant 0 : index
    %c0_21 = arith.constant 0 : index
    %39 = vector.load %arg2[%c0_16, %c0_17, %c0_18, %c1_19, %c0_20, %c0_21] : memref<1x1x8x2x8x8xf32, #tpu.memory_space<vmem>>, vector<1x1x8x1x8x8xf32>
    %40 = vector.shape_cast %39 : vector<1x1x8x1x8x8xf32> to vector<8x8x8xf32>
    %41 = vector.extract_strided_slice %40 {offsets = [0, 0, 0], sizes = [8, 8, 4], strides = [1, 1, 1]} : vector<8x8x8xf32> to vector<8x8x4xf32>
    %42 = math.exp %41 : vector<8x8x4xf32>
    %43 = arith.mulf %41, %41 : vector<8x8x4xf32>
    %44 = arith.addf %43, %13 : vector<8x8x4xf32>
    %45 = arith.mulf %14, %41 : vector<8x8x4xf32>
    %46 = arith.divf %45, %44 : vector<8x8x4xf32>
    %47 = math.exp %46 : vector<8x8x4xf32>
    %48 = arith.mulf %42, %41 : vector<8x8x4xf32>
    %49 = arith.addf %34, %48 : vector<8x8x4xf32>
    %50 = arith.addf %35, %42 : vector<8x8x4xf32>
    %51 = arith.mulf %47, %41 : vector<8x8x4xf32>
    %52 = arith.addf %37, %51 : vector<8x8x4xf32>
    %53 = arith.addf %38, %47 : vector<8x8x4xf32>
    %54 = vector.extract_strided_slice %40 {offsets = [0, 0, 4], sizes = [8, 8, 4], strides = [1, 1, 1]} : vector<8x8x8xf32> to vector<8x8x4xf32>
    %55 = math.exp %54 : vector<8x8x4xf32>
    %56 = arith.mulf %54, %54 : vector<8x8x4xf32>
    %57 = arith.addf %56, %13 : vector<8x8x4xf32>
    %58 = arith.mulf %14, %54 : vector<8x8x4xf32>
    %59 = arith.divf %58, %57 : vector<8x8x4xf32>
    %60 = math.exp %59 : vector<8x8x4xf32>
    %61 = arith.mulf %55, %54 : vector<8x8x4xf32>
    %62 = arith.addf %49, %61 : vector<8x8x4xf32>
    %63 = arith.addf %50, %55 : vector<8x8x4xf32>
    %64 = arith.mulf %60, %54 : vector<8x8x4xf32>
    %65 = arith.addf %52, %64 : vector<8x8x4xf32>
    %66 = arith.addf %53, %60 : vector<8x8x4xf32>
    %67 = arith.divf %62, %63 : vector<8x8x4xf32>
    %68 = arith.cmpf one, %67, %67 : vector<8x8x4xf32>
    %cst_22 = arith.constant 0.000000e+00 : f32
    %69 = vector.broadcast %cst_22 : f32 to vector<8x8x4xf32>
    %70 = arith.select %68, %69, %67 : vector<8x8x4xi1>, vector<8x8x4xf32>
    %cst_23 = arith.constant 0x7F800000 : f32
    %71 = vector.broadcast %cst_23 : f32 to vector<8x8x4xf32>
    %72 = arith.cmpf oeq, %70, %71 : vector<8x8x4xf32>
    %cst_24 = arith.constant 3.40282347E+38 : f32
    %73 = vector.broadcast %cst_24 : f32 to vector<8x8x4xf32>
    %74 = arith.select %72, %73, %70 : vector<8x8x4xi1>, vector<8x8x4xf32>
    %cst_25 = arith.constant 0xFF800000 : f32
    %75 = vector.broadcast %cst_25 : f32 to vector<8x8x4xf32>
    %76 = arith.cmpf oeq, %74, %75 : vector<8x8x4xf32>
    %cst_26 = arith.constant -3.40282347E+38 : f32
    %77 = vector.broadcast %cst_26 : f32 to vector<8x8x4xf32>
    %78 = arith.select %76, %77, %74 : vector<8x8x4xi1>, vector<8x8x4xf32>
    %79 = arith.divf %65, %66 : vector<8x8x4xf32>
    %80 = arith.cmpf one, %79, %79 : vector<8x8x4xf32>
    %cst_27 = arith.constant 0.000000e+00 : f32
    %81 = vector.broadcast %cst_27 : f32 to vector<8x8x4xf32>
    %82 = arith.select %80, %81, %79 : vector<8x8x4xi1>, vector<8x8x4xf32>
    %cst_28 = arith.constant 0x7F800000 : f32
    %83 = vector.broadcast %cst_28 : f32 to vector<8x8x4xf32>
    %84 = arith.cmpf oeq, %82, %83 : vector<8x8x4xf32>
    %cst_29 = arith.constant 3.40282347E+38 : f32
    %85 = vector.broadcast %cst_29 : f32 to vector<8x8x4xf32>
    %86 = arith.select %84, %85, %82 : vector<8x8x4xi1>, vector<8x8x4xf32>
    %cst_30 = arith.constant 0xFF800000 : f32
    %87 = vector.broadcast %cst_30 : f32 to vector<8x8x4xf32>
    %88 = arith.cmpf oeq, %86, %87 : vector<8x8x4xf32>
    %cst_31 = arith.constant -3.40282347E+38 : f32
    %89 = vector.broadcast %cst_31 : f32 to vector<8x8x4xf32>
    %90 = arith.select %88, %89, %86 : vector<8x8x4xi1>, vector<8x8x4xf32>
    %c0_32 = arith.constant 0 : index
    %c0_33 = arith.constant 0 : index
    %c0_34 = arith.constant 0 : index
    %c0_35 = arith.constant 0 : index
    %91 = vector.load %arg3[%c0_32, %c0_33, %c0_34, %c0_35] : memref<1x8x8x1xf32, #tpu.memory_space<vmem>>, vector<1x8x8x1xf32>
    %92 = vector.shape_cast %91 : vector<1x8x8x1xf32> to vector<8x8x1xf32>
    %93 = vector.broadcast %92 : vector<8x8x1xf32> to vector<8x8x4xf32>
    %94 = arith.mulf %93, %90 : vector<8x8x4xf32>
    %cst_36 = arith.constant 1.000000e+00 : f32
    %95 = vector.broadcast %cst_36 : f32 to vector<8x8x1xf32>
    %96 = arith.subf %95, %92 : vector<8x8x1xf32>
    %97 = vector.broadcast %96 : vector<8x8x1xf32> to vector<8x8x4xf32>
    %98 = arith.mulf %97, %78 : vector<8x8x4xf32>
    %99 = arith.addf %94, %98 : vector<8x8x4xf32>
    %100 = arith.cmpf one, %99, %99 : vector<8x8x4xf32>
    %cst_37 = arith.constant 0.000000e+00 : f32
    %101 = vector.broadcast %cst_37 : f32 to vector<8x8x4xf32>
    %102 = arith.select %100, %101, %99 : vector<8x8x4xi1>, vector<8x8x4xf32>
    %cst_38 = arith.constant 0x7F800000 : f32
    %103 = vector.broadcast %cst_38 : f32 to vector<8x8x4xf32>
    %104 = arith.cmpf oeq, %102, %103 : vector<8x8x4xf32>
    %cst_39 = arith.constant 3.40282347E+38 : f32
    %105 = vector.broadcast %cst_39 : f32 to vector<8x8x4xf32>
    %106 = arith.select %104, %105, %102 : vector<8x8x4xi1>, vector<8x8x4xf32>
    %cst_40 = arith.constant 0xFF800000 : f32
    %107 = vector.broadcast %cst_40 : f32 to vector<8x8x4xf32>
    %108 = arith.cmpf oeq, %106, %107 : vector<8x8x4xf32>
    %cst_41 = arith.constant -3.40282347E+38 : f32
    %109 = vector.broadcast %cst_41 : f32 to vector<8x8x4xf32>
    %110 = arith.select %108, %109, %106 : vector<8x8x4xi1>, vector<8x8x4xf32>
    %c0_42 = arith.constant 0 : index
    %c0_43 = arith.constant 0 : index
    %c0_44 = arith.constant 0 : index
    %c0_45 = arith.constant 0 : index
    %111 = vector.load %arg4[%c0_42, %c0_43, %c0_44, %c0_45] : memref<1x8x8x4xf32, #tpu.memory_space<vmem>>, vector<1x8x8x4xf32>
    %112 = vector.shape_cast %111 : vector<1x8x8x4xf32> to vector<8x8x4xf32>
    %113 = vector.shape_cast %110 : vector<8x8x4xf32> to vector<1x8x8x4xf32>
    tpu.vector_store %arg4[%c0_42, %c0_43, %c0_44, %c0_45], %113 {strides = array<i32>} : memref<1x8x8x4xf32, #tpu.memory_space<vmem>>, vector<1x8x8x4xf32>,
    return
  }
  func.func @transform_0(%arg0: i32, %arg1: i32) -> (i32, i32, i32, i32, i32, i32) {
    %c0_i32 = arith.constant 0 : i32
    %c0_i32_0 = arith.constant 0 : i32
    %c0_i32_1 = arith.constant 0 : i32
    %c0_i32_2 = arith.constant 0 : i32
    %c0_i32_3 = arith.constant 0 : i32
    return %arg0, %arg1, %c0_i32, %c0_i32_0, %c0_i32_1, %c0_i32_2 : i32, i32, i32, i32, i32, i32
  }
  func.func @transform_1(%arg0: i32, %arg1: i32) -> (i32, i32, i32, i32) {
    %c0_i32 = arith.constant 0 : i32
    %c0_i32_0 = arith.constant 0 : i32
    %c0_i32_1 = arith.constant 0 : i32
    %c0_i32_2 = arith.constant 0 : i32
    return %arg1, %c0_i32, %c0_i32_0, %c0_i32_1 : i32, i32, i32, i32
  }
  func.func @transform_2(%arg0: i32, %arg1: i32) -> (i32, i32, i32, i32) {
    %c0_i32 = arith.constant 0 : i32
    %c0_i32_0 = arith.constant 0 : i32
    %c0_i32_1 = arith.constant 0 : i32
    return %arg0, %arg1, %c0_i32, %c0_i32_0 : i32, i32, i32, i32
  }
}

</mosaic_0001>

<bundles_post_ra>
// kernel: tpu_custom_call.1
= control target key start
LH: loop header
LB: loop body
LE: loop exit
PB: predicated region body
PF: predicated region fallthrough
CT: control target
= control target key end

     0   :  { %7 = vsyncpa [#allocation3], 0  ;;  %s2926_s0 = inlined_call_operand.hbm [shape: f32[2,1,8,2,8,8], index: 0, kind: input, shape index: {}]   ;;  %s2927_s1 = inlined_call_operand.vmem [shape: f32[1,8,8,1], index: 1, kind: input, shape index: {}]   ;;  %s2928_s2 = inlined_call_operand.vmem [shape: f32[2,8,8,4], index: 2, kind: output, shape index: {}]  }
   0x1   :  { %9 = vsyncpa [#allocation3 + $0x1], 0  ;;  %s1751_s9 = smov 0   ;;  %s1753_s10 = smov 0  }
   0x2   :  { %s1755_s11 = smov 0   ;;  %s1757_s12 = smov 0  }
   0x3   :  { %s1759_s13 = smov 0   ;;  %s1761_s14 = smov 0  }
   0x4 LB: > { %s1363_s15 = sadd.s32 4294967295, %s1728_s14   ;;  %s27_s16 = sadd.s32 1, %s1724_s13  ;;  %s1728_s14 = sphi %s1761_s14, %s15_s14   ;;  %s1724_s13 = sphi %s1759_s13, %s3109_s13   ;;  %s1720_s12 = sphi %s1757_s12, %s3108_s12   ;;  %s1716_s11 = sphi %s1755_s11, %s3107_s11   ;;  %s1712_s10 = sphi %s1753_s10, %s3106_s10   ;;  %s1708_s9 = sphi %s1751_s9, %s3105_s9  }
   0x5   : > { %p29_p0 = scmp.ge.s32.totalorder %s27_s16, 2  ;;  %s36_s17 = sadd.s32 1, %s1716_s11 }
   0x6   : > { %p43_p1 = scmp.ne.s32.totalorder %s1716_s11, %s1712_s10  ;;  %p44_p2 = scmp.eq.s32.totalorder %s1728_s14, 0 }
   0x7   : > { %s3111_s16 = smov (%p29_p0, %s27_s16), 0  ;;  %p49_p4 = scmp.ne.s32.totalorder %s1712_s10, %s1708_s9 }
   0x8   : > { %p1787_p3 = por %p44_p2, %p43_p1  ;;  %s31_s19 = ssub.s32 %s1724_s13, %s3111_s16 }
   0x9   : > { %p50_p5 = scmp.eq.s32.totalorder %s1363_s15, 0  ;;  %p34_p6 = scmp.eq.s32.totalorder %s31_s19, 0 }
   0xa   : > { %p1393_p8 = scmp.lt.s32.totalorder %s1728_s14, 2  ;;  %s135_s22 = sand.u32 1, %s1716_s11  }
   0xb   : > { %p1794_p7 = por %p50_p5, %p49_p4  ;;  %s1385_s23 = sshll.u32 %s1724_s13, 11 }
   0xc   : > { %s1800_s21 = scalar_select %p34_p6, %s1716_s11, %s36_s17  }
   0xd   : > { %s1368_s24 = sshll.u32 %s135_s22, 7  ;;  %s147_s27 = scalar_lea.hbm %s2926_s0, %s1385_s23 }
   0xe   : > { %s139_s28 = scalar_lea.vmem [#allocation2], %s1368_s24  ;;  %p1809_p9 = pnand %p1393_p8, %p1787_p3 }
   0xf   : > { %s148_s29 = sshll.u32 %s139_s28, 4  ;;  %s136_s3 = scalar_lea.sflag [#allocation3], %s135_s22  ;;  %s149_s29 = int_to_ptr.vmem [resolvable:$true] %s148_s29 }
  0x10   : > { %p1652_p10 = pneg %p1809_p9  ;;  %s1663_s4 = scalar_lea.vmem %s149_s29, 2048 }
  0x11   : > { %p1664_p11 = scmp.ne.s32.totalorder %s149_s29, %s1663_s4  ;;  %s1730_s5 = smov [#allocation2]  }
  0x12   : > { %s1668_s6 = sshll.u32 %s1730_s5, 4  ;;  %s1669_s6 = int_to_ptr.vmem [resolvable:$false] %s1668_s6 }
  0x13   : > { %p1666_p12 = pnand %p1664_p11, %p1652_p10  ;;  %s1670_s7 = scalar_lea.vmem %s1669_s6, 4096 }
  0x14   : > { %p1671_p0 = scmp.lt.s32.totalorder %s149_s29, %s1669_s6  ;;  %p1672_p1 = scmp.lt.s32.totalorder %s1670_s7, %s1663_s4 }
  0x15   : > { %p1667_p13 = pneg %p1666_p12 }
  0x16   : > { %p1673_p2 = por %p1672_p1, %p1671_p0 }
  0x18   : > { %p1674_p3 = pnand %p1673_p2, %p1667_p13 }
  0x1a   : > { %1677 = shalt.err (!%p1674_p3)
}
  0x1b   : > { %s1731_s8 = smov 128   ;;  %s1732_s9 = smov 8  }
  0x1c   : > { %1392 = dma.hbm_to_vmem [thread:$0]  (!%p1809_p9), %s147_s27, 2048, %s149_s29, %s136_s3, %s1731_s8, %s1731_s8, %s1732_s9  }
  0x1d   : > { %p1371_p4 = scmp.ge.s32.totalorder %s1728_s14, 1  ;;  %p156_p5 = scmp.lt.s32.totalorder %s1728_s14, 3 }
  0x1f   : > { %p157_p6 = pnand %p1371_p4, %p156_p5 }
  0x21   : > { %160 = sbr.rel (%p157_p6) target bundleno = 522 (0x20a), region = 28 }
  0x26   : > { %s162_s15 = sand.u32 1, %s1712_s10  }
  0x27   : > { %s1372_s17 = sshll.u32 %s162_s15, 7  ;;  %s163_s18 = scalar_lea.sflag [#allocation3], %s162_s15 }
  0x28   : > { %s1820_s19 = scalar_lea.vmem [#allocation2], %s1372_s17 }
  0x29   : > { %1703 = dma.done.wait (%p1794_p7), %s163_s18, 2048  }
  0x2a   : > { %1705 = vsyncadd (%p1794_p7), %s163_s18, 4294965248  ;;  %v1827_v0 = vld [vmem:[%s1820_s19 + $0x20] sm:$0xff]  ;;  %s1733_s22 = smov 124   ;;  %v1837_v2 = vld [vmem:[%s1820_s19 + $0x30] sm:$0xff]  ;;  %s1734_s20 = smov 4  }
  0x2b   : > { %v1830_v1 = vld [vmem:[%s1820_s19] sm:$0xff]  ;;  %231 = vrot.lane.b32.xlu1 %v1827_v0, %s1733_s22  ;;  %v1840_v3 = vld [vmem:[%s1820_s19 + $0x10] sm:$0xff]  ;;  %v344_v10 = vmul.f32 1.442695, %v1827_v0  ;;  %v346_v11 = vmul.f32 1.442695, %v1837_v2 }
  0x2c   : > { %227 = vrot.lane.b32.xlu0 %v1830_v1, %s1733_s22  ;;  %2990 = vst [vmem:[#allocation5_spill] sm:$0xff] %v1840_v3  ;;  %v1847_v4 = vld [vmem:[%s1820_s19 + $0x50] sm:$0xff]  ;;  %v1850_v5 = vld [vmem:[%s1820_s19 + $0x40] sm:$0xff]  ;;  %v340_v6 = vmul.f32 1.442695, %v1830_v1  ;;  %v1871_v12 = vld [vmem:[%s1820_s19 + $0x18] sm:$0xff] }
  0x2d   : > { %v342_v7 = vmul.f32 1.442695, %v1840_v3  ;;  %v1859_v8 = vld [vmem:[%s1820_s19 + $0x70] sm:$0xff]  ;;  %v1862_v9 = vld [vmem:[%s1820_s19 + $0x60] sm:$0xff]  ;;  %2991 = vst [vmem:[#allocation6_spill] sm:$0xff] %v1871_v12  ;;  %v1874_v13 = vld [vmem:[%s1820_s19 + $0x8] sm:$0xff] }
  0x2e   : > { %1449 = vpow2.f32 %v340_v6  ;;  %2992 = vst [vmem:[#allocation7_spill] sm:$0xff] %v1874_v13  ;;  %v350_v14 = vmul.f32 1.442695, %v1847_v4  ;;  %v348_v15 = vmul.f32 1.442695, %v1850_v5  ;;  %v1883_v16 = vld [vmem:[%s1820_s19 + $0x38] sm:$0xff] }
  0x2f   : > { %233 = vrot.lane.b32.xlu1 %v1837_v2, %s1733_s22  ;;  %1451 = vpow2.f32 %v342_v7  ;;  %v1886_v17 = vld [vmem:[%s1820_s19 + $0x28] sm:$0xff]  ;;  %v1893_v18 = vld [vmem:[%s1820_s19 + $0x58] sm:$0xff]  ;;  %v354_v52 = vmul.f32 1.442695, %v1859_v8  ;;  %v352_v53 = vmul.f32 1.442695, %v1862_v9 }
  0x30   : > { %229 = vrot.lane.b32.xlu0 %v1840_v3, %s1733_s22  ;;  %1453 = vpow2.f32 %v344_v10  ;;  %v1896_v19 = vld [vmem:[%s1820_s19 + $0x48] sm:$0xff]  ;;  %v1907_v22 = vld [vmem:[%s1820_s19 + $0x78] sm:$0xff]  ;;  %v646_v62 = vmul.f32 1.442695, %v1871_v12  ;;  %v644_v63 = vmul.f32 1.442695, %v1874_v13 }
  0x31   : > { %1455 = vpow2.f32 %v346_v11  ;;  %v1910_v23 = vld [vmem:[%s1820_s19 + $0x68] sm:$0xff]  ;;  %p202_p7 = scmp.lt.s32.totalorder %s1720_s12, 1 }
  0x32   : > { %1457 = vpow2.f32 %v350_v14  ;;  %v2014_v14 = vmul.f32 %v1840_v3, %v1840_v3 }
  0x33   : > { %237 = vrot.lane.b32.xlu1 %v1847_v4, %s1733_s22  ;;  %1459 = vpow2.f32 %v348_v15  ;;  %s3113_s12 = smov (!%p202_p7, %s1720_s12), 1 }
  0x34   : > { %235 = vrot.lane.b32.xlu0 %v1850_v5, %s1733_s22  ;;  %1461 = vpow2.f32 %v354_v52  ;;  %s1386_s17 = sshll.u32 %s3113_s12, 6 }
  0x35   : > { %1463 = vpow2.f32 %v352_v53 }
  0x36   : > { %1465 = vpow2.f32 %v646_v62 }
  0x37   : > { %241 = vrot.lane.b32.xlu1 %v1859_v8, %s1733_s22  ;;  %1467 = vpow2.f32 %v644_v63 }
  0x38   : > { %239 = vrot.lane.b32.xlu0 %v1862_v9, %s1733_s22 }
  0x3b   : > { %286 = vrot.lane.b32.xlu1 %v1871_v12, %s1733_s22  ;;  %v1898_v20 = vpop.eup %1449 }
  0x3c   : > { %284 = vrot.lane.b32.xlu0 %v1874_v13, %s1733_s22  ;;  %v1904_v21 = vpop.eup %1451  ;;  %v1924_v26 = vmul.f32 %v1898_v20, %v1830_v1 }
  0x3d   : > { %v1912_v24 = vpop.eup %1453  ;;  %v1920_v25 = vmul.f32 %v1904_v21, %v1840_v3 }
  0x3e   : > { %2993 = vst [vmem:[#allocation8_spill] sm:$0xff] %v1912_v24  ;;  %v1926_v27 = vpop.eup %1455  ;;  %v1940_v30 = vmul.f32 %v1912_v24, %v1827_v0 }
  0x3f   : > { %290 = vrot.lane.b32.xlu1 %v1883_v16, %s1733_s22  ;;  %v1928_v28 = vpop.eup %1457  ;;  %v1936_v29 = vmul.f32 %v1926_v27, %v1837_v2 }
  0x40   : > { %288 = vrot.lane.b32.xlu0 %v1886_v17, %s1733_s22  ;;  %2994 = vst [vmem:[#allocation9_spill] sm:$0xff] %v1928_v28  ;;  %2996 = vst [vmem:[#allocation11_spill] sm:$0xff] %v1940_v30  ;;  %v1942_v31 = vpop.eup %1459  ;;  %v1950_v32 = vmul.f32 %v1928_v28, %v1847_v4 }
  0x41   : > { %2995 = vst [vmem:[#allocation10_spill] sm:$0xff] %v1936_v29  ;;  %2997 = vst [vmem:[#allocation12_spill] sm:$0xff] %v1942_v31  ;;  %v1954_v33 = vmul.f32 %v1942_v31, %v1850_v5 }
  0x42   : > { %2998 = vst [vmem:[#allocation13_spill] sm:$0xff] %v1950_v32 }
  0x43   : > { %294 = vrot.lane.b32.xlu1 %v1893_v18, %s1733_s22  ;;  %2999 = vst [vmem:[#allocation14_spill] sm:$0xff] %v1954_v33 }
  0x44   : > { %292 = vrot.lane.b32.xlu0 %v1896_v19, %s1733_s22 }
  0x47   : > { %298 = vrot.lane.b32.xlu1 %v1907_v22, %s1733_s22 }
  0x48   : > { %296 = vrot.lane.b32.xlu0 %v1910_v23, %s1733_s22 }
  0x4b   : > { %550 = vrot.lane.b32.xlu1 %v1920_v25, %s1733_s22 }
  0x4c   : > { %548 = vrot.lane.b32.xlu0 %v1924_v26, %s1733_s22 }
  0x4f   : > { %554 = vrot.lane.b32.xlu1 %v1936_v29, %s1733_s22  ;;  %v2109_v29 = vmul.f32 %v1847_v4, %v1847_v4 }
  0x50   : > { %552 = vrot.lane.b32.xlu0 %v1940_v30, %s1733_s22 }
  0x53   : > { %558 = vrot.lane.b32.xlu1 %v1950_v32, %s1733_s22 }
  0x54   : > { %556 = vrot.lane.b32.xlu0 %v1954_v33, %s1733_s22 }
  0x9d   : > { %v1960_v34 = vpop.permute.xlu1 %231 }
  0x9e   : > { %3000 = vst [vmem:[#allocation15_spill] sm:$0xff] %v1960_v34  ;;  %v1962_v35 = vpop.permute.xlu0 %227  ;;  %v253_v44 = vadd.f32 %v1960_v34, %v1827_v0 }
  0x9f   : > { %3001 = vst [vmem:[#allocation16_spill] sm:$0xff] %v1962_v35  ;;  %v251_v40 = vadd.f32 %v1962_v35, %v1830_v1 }
  0xa0   : > { %v270_v55 = vadd.f32 %v1886_v17, %v253_v44 }
  0xa1   : > { %v1964_v36 = vpop.permute.xlu1 %233  ;;  %v268_v47 = vadd.f32 %v1874_v13, %v251_v40 }
  0xa2   : > { %3002 = vst [vmem:[#allocation17_spill] sm:$0xff] %v1964_v36  ;;  %v1966_v37 = vpop.permute.xlu0 %229  ;;  %v254_v45 = vadd.f32 %v1964_v36, %v1837_v2  ;;  %v2130_v36 = vmul.f32 %v1850_v5, %v1850_v5 }
  0xa3   : > { %3003 = vst [vmem:[#allocation18_spill] sm:$0xff] %v1966_v37  ;;  %v252_v41 = vadd.f32 %v1966_v37, %v1840_v3 }
  0xa4   : > { %v271_v54 = vadd.f32 %v1883_v16, %v254_v45 }
  0xa5   : > { %v1968_v38 = vpop.permute.xlu1 %237  ;;  %v269_v46 = vadd.f32 %v1871_v12, %v252_v41  ;;  %v2020_v41 = vmul.f32 %v1871_v12, %v1871_v12 }
  0xa6   : > { %3004 = vst [vmem:[#allocation19_spill] sm:$0xff] %v1968_v38  ;;  %v1970_v39 = vpop.permute.xlu0 %235  ;;  %v256_v56 = vadd.f32 %v1968_v38, %v1847_v4 }
  0xa7   : > { %3005 = vst [vmem:[#allocation20_spill] sm:$0xff] %v1970_v39  ;;  %v255_v57 = vadd.f32 %v1970_v39, %v1850_v5  ;;  %3012 = vst [vmem:[#allocation27_spill] sm:$0xff] %v2020_v41 }
  0xa8   : > { %v273_v15 = vadd.f32 %v1893_v18, %v256_v56 }
  0xa9   : > { %v1976_v42 = vpop.permute.xlu1 %241  ;;  %v272_v40 = vadd.f32 %v1896_v19, %v255_v57  ;;  %v2044_v57 = vmul.f32 %v1830_v1, %v1830_v1 }
  0xaa   : > { %3006 = vst [vmem:[#allocation21_spill] sm:$0xff] %v1976_v42  ;;  %v1978_v43 = vpop.permute.xlu0 %239  ;;  %v258_v44 = vadd.f32 %v1976_v42, %v1859_v8 }
  0xab   : > { %3007 = vst [vmem:[#allocation22_spill] sm:$0xff] %v1978_v43  ;;  %v257_v45 = vadd.f32 %v1978_v43, %v1862_v9 }
  0xac   : > { %v275_v63 = vadd.f32 %v1907_v22, %v258_v44 }
  0xad   : > { %v1986_v48 = vpop.permute.xlu1 %286 }
  0xae   : > { %3008 = vst [vmem:[#allocation23_spill] sm:$0xff] %v1986_v48  ;;  %v1988_v49 = vpop.permute.xlu0 %284  ;;  %v309_v50 = vadd.f32 %v1986_v48, %v269_v46  ;;  %v2142_v48 = vmul.f32 %v1896_v19, %v1896_v19 }
  0xaf   : > { %3009 = vst [vmem:[#allocation24_spill] sm:$0xff] %v1988_v49  ;;  %v308_v51 = vadd.f32 %v1988_v49, %v268_v47 }
  0xb0   : > { %v317_v58 = vmul.f32 0.25, %v309_v50 }
  0xb1   : > { %v2000_v59 = vmul.f32 0.25, %v308_v51  ;;  %v2002_v60 = vpop.permute.xlu1 %290 }
  0xb2   : > { %3010 = vst [vmem:[#allocation25_spill] sm:$0xff] %v2002_v60  ;;  %v2004_v61 = vpop.permute.xlu0 %288  ;;  %v311_v6 = vadd.f32 %v2002_v60, %v271_v54  ;;  %v325_v10 = vmul.f32 %v317_v58, %v317_v58  ;;  %v2094_v32 = vadd.f32 %v317_v58, %v317_v58  ;;  %v2126_v60 = vmul.f32 %v1893_v18, %v1893_v18 }
  0xb3   : > { %3011 = vst [vmem:[#allocation26_spill] sm:$0xff] %v2004_v61  ;;  %v310_v7 = vadd.f32 %v2004_v61, %v270_v55  ;;  %v324_v11 = vmul.f32 %v2000_v59, %v2000_v59 }
  0xb4   : > { %438 = vrot.lane.b32.xlu1 %v325_v10, %s1734_s20  ;;  %v2031_v50 = vmul.f32 0.25, %v311_v6  ;;  %v365_v54 = vadd.f32 %v2014_v14, %v325_v10  ;;  %v669_v56 = vadd.f32 %v2020_v41, %v325_v10  ;;  %v274_v10 = vadd.f32 %v1910_v23, %v257_v45  ;;  %3021 = vst [vmem:[#allocation36_spill] sm:$0xff] %v2094_v32 }
  0xb5   : > { %v2027_v46 = vpop.permute.xlu1 %294  ;;  %v2033_v51 = vmul.f32 0.25, %v310_v7  ;;  %436 = vrot.lane.b32.xlu0 %v324_v11, %s1734_s20  ;;  %v364_v45 = vadd.f32 %v2044_v57, %v324_v11 }
  0xb6   : > { %3013 = vst [vmem:[#allocation28_spill] sm:$0xff] %v2027_v46  ;;  %v2029_v47 = vpop.permute.xlu0 %292  ;;  %v313_v52 = vadd.f32 %v2027_v46, %v273_v15  ;;  %v327_v7 = vmul.f32 %v2031_v50, %v2031_v50  ;;  %1469 = vrcp.f32 %v365_v54  ;;  %v2073_v54 = vmul.f32 %v1837_v2, %v1837_v2 }
  0xb7   : > { %3014 = vst [vmem:[#allocation29_spill] sm:$0xff] %v2029_v47  ;;  %v312_v53 = vadd.f32 %v2029_v47, %v272_v40  ;;  %v326_v15 = vmul.f32 %v2033_v51, %v2033_v51  ;;  %1471 = vrcp.f32 %v669_v56  ;;  %v2090_v56 = vmul.f32 %v1827_v0, %v1827_v0 }
  0xb8   : > { %v2039_v55 = vmul.f32 0.25, %v313_v52  ;;  %442 = vrot.lane.b32.xlu1 %v327_v7, %s1734_s20  ;;  %v2061_v52 = vmul.f32 %v1874_v13, %v1874_v13  ;;  %1473 = vrcp.f32 %v364_v45  ;;  %v367_v30 = vadd.f32 %v2073_v54, %v327_v7 }
  0xb9   : > { %v2046_v6 = vmul.f32 0.25, %v312_v53  ;;  %v2052_v62 = vpop.permute.xlu1 %298  ;;  %440 = vrot.lane.b32.xlu0 %v326_v15, %s1734_s20  ;;  %v366_v34 = vadd.f32 %v2090_v56, %v326_v15 }
  0xba   : > { %3015 = vst [vmem:[#allocation30_spill] sm:$0xff] %v2052_v62  ;;  %v2054_v40 = vpop.permute.xlu0 %296  ;;  %3017 = vst [vmem:[#allocation32_spill] sm:$0xff] %v2061_v52  ;;  %v315_v53 = vadd.f32 %v2052_v62, %v275_v63  ;;  %v329_v42 = vmul.f32 %v2039_v55, %v2039_v55  ;;  %v668_v47 = vadd.f32 %v2061_v52, %v324_v11 }
  0xbb   : > { %3016 = vst [vmem:[#allocation31_spill] sm:$0xff] %v2054_v40  ;;  %v314_v43 = vadd.f32 %v2054_v40, %v274_v10  ;;  %v328_v44 = vmul.f32 %v2046_v6, %v2046_v6  ;;  %v2079_v63 = vmul.f32 %v1883_v16, %v1883_v16  ;;  %v2081_v10 = vpop.eup %1461  ;;  %v2098_v11 = vmul.f32 %v1886_v17, %v1886_v17 }
  0xbc   : > { %446 = vrot.lane.b32.xlu1 %v329_v42, %s1734_s20  ;;  %3019 = vst [vmem:[#allocation34_spill] sm:$0xff] %v2081_v10  ;;  %v2083_v40 = vmul.f32 0.25, %v315_v53  ;;  %v2092_v33 = vpop.eup %1463  ;;  %v2113_v58 = vmul.f32 %v2081_v10, %v1859_v8  ;;  %1475 = vrcp.f32 %v668_v47  ;;  %v369_v52 = vadd.f32 %v2109_v29, %v329_v42 }
  0xbd   : > { %3018 = vst [vmem:[#allocation33_spill] sm:$0xff] %v2079_v63  ;;  %v2085_v62 = vmul.f32 0.25, %v314_v43  ;;  %444 = vrot.lane.b32.xlu0 %v328_v44, %s1734_s20  ;;  %3020 = vst [vmem:[#allocation35_spill] sm:$0xff] %v2092_v33  ;;  %v551_v39 = vpop.permute.xlu1 %550  ;;  %v671_v46 = vadd.f32 %v2079_v63, %v327_v7  ;;  %v2116_v38 = vpop.eup %1465  ;;  %v2121_v61 = vmul.f32 %v2092_v33, %v1862_v9  ;;  %1477 = vrcp.f32 %v367_v30 }
  0xbe   : > { %v331_v53 = vmul.f32 %v2083_v40, %v2083_v40  ;;  %v549_v45 = vpop.permute.xlu0 %548  ;;  %v2132_v47 = vpop.eup %1467  ;;  %v373_v7 = vmul.f32 %v2094_v32, %v1840_v3  ;;  %v573_v49 = vadd.f32 %v551_v39, %v1920_v25  ;;  %v670_v35 = vadd.f32 %v2098_v11, %v326_v15 }
  0xbf   : > { %v2104_v43 = vmul.f32 %v2085_v62, %v2085_v62  ;;  %v572_v63 = vadd.f32 %v549_v45, %v1924_v26  ;;  %v2148_v3 = vmul.f32 %v1859_v8, %v1859_v8  ;;  %v2152_v41 = vmul.f32 %v2116_v38, %v1871_v12 }
  0xc0   : > { %450 = vrot.lane.b32.xlu1 %v331_v53, %s1734_s20  ;;  %1479 = vrcp.f32 %v671_v46  ;;  %v2158_v39 = vmul.f32 %v1907_v22, %v1907_v22  ;;  %v2162_v26 = vadd.f32 %v2000_v59, %v2000_v59  ;;  %v2168_v30 = vmul.f32 %v2132_v47, %v1874_v13 }
  0xc1   : > { %448 = vrot.lane.b32.xlu0 %v2104_v43, %s1734_s20  ;;  %1481 = vrcp.f32 %v366_v34  ;;  %v677_v46 = vmul.f32 %v1871_v12, %v2094_v32  ;;  %v368_v59 = vadd.f32 %v2130_v36, %v328_v44  ;;  %v2177_v15 = vadd.f32 %v2152_v41, %v573_v49 }
  0xc2   : > { %1483 = vrcp.f32 %v670_v35  ;;  %v2182_v34 = vmul.f32 %v1862_v9, %v1862_v9  ;;  %v371_v35 = vadd.f32 %v2148_v3, %v331_v53  ;;  %v2194_v49 = vmul.f32 %v1910_v23, %v1910_v23 }
  0xc3   : > { %v1470_v37 = vpop.eup %1469  ;;  %1485 = vrcp.f32 %v369_v52  ;;  %v372_v52 = vmul.f32 %v2162_v26, %v1830_v1  ;;  %v676_v1 = vmul.f32 %v1874_v13, %v2162_v26 }
  0xc4   : > { %v2154_v25 = vmul.f32 %v1470_v37, %v373_v7  ;;  %562 = vrot.lane.b32.xlu1 %v2113_v58, %s1733_s22  ;;  %v673_v37 = vadd.f32 %v2126_v60, %v329_v42  ;;  %v1472_v45 = vpop.eup %1471  ;;  %v672_v7 = vadd.f32 %v2142_v48, %v328_v44  ;;  %v2185_v42 = vadd.f32 %v2168_v30, %v572_v63 }
  0xc5   : > { %560 = vrot.lane.b32.xlu0 %v2121_v61, %s1733_s22  ;;  %v2187_v12 = vmul.f32 %v1472_v45, %v677_v46  ;;  %v675_v44 = vadd.f32 %v2158_v39, %v331_v53  ;;  %v1474_v63 = vpop.eup %1473  ;;  %v2203_v46 = vadd.f32 %v2031_v50, %v2031_v50  ;;  %v650_v45 = vmul.f32 1.442695, %v1883_v16 }
  0xc6   : > { %1487 = vrcp.f32 %v673_v37  ;;  %v370_v37 = vadd.f32 %v2182_v34, %v2104_v43  ;;  %v2210_v32 = vmul.f32 %v1474_v63, %v372_v52  ;;  %v2214_v53 = vadd.f32 %v2033_v51, %v2033_v51 }
  0xc7   : > { %3022 = vst [vmem:[#allocation37_spill] sm:$0xff] %v2187_v12  ;;  %1489 = vrcp.f32 %v368_v59  ;;  %v674_v50 = vadd.f32 %v2194_v49, %v2104_v43  ;;  %v648_v59 = vmul.f32 1.442695, %v1886_v17  ;;  %v375_v52 = vmul.f32 %v2203_v46, %v1837_v2 }
  0xc8   : > { %590 = vrot.lane.b32.xlu1 %v1904_v21, %s1733_s22  ;;  %1491 = vrcp.f32 %v672_v7  ;;  %v2229_v51 = vadd.f32 %v2039_v55, %v2039_v55  ;;  %v679_v43 = vmul.f32 %v1883_v16, %v2203_v46  ;;  %v374_v13 = vmul.f32 %v2214_v53, %v1827_v0 }
  0xc9   : > { %588 = vrot.lane.b32.xlu0 %v1898_v20, %s1733_s22  ;;  %v1476_v12 = vpop.eup %1475  ;;  %1493 = vrcp.f32 %v371_v35  ;;  %v678_v55 = vmul.f32 %v1886_v17, %v2214_v53 }
  0xca   : > { %v2223_v7 = vmul.f32 %v1476_v12, %v676_v1  ;;  %1495 = vrcp.f32 %v675_v44  ;;  %v1478_v35 = vpop.eup %1477  ;;  %v2243_v44 = vadd.f32 %v2046_v6, %v2046_v6  ;;  %v2259_v6 = vadd.f32 %v2083_v40, %v2083_v40 }
  0xcb   : > { %1497 = vrcp.f32 %v370_v37  ;;  %v2237_v12 = vmul.f32 %v1478_v35, %v375_v52  ;;  %v681_v52 = vmul.f32 %v1893_v18, %v2229_v51  ;;  %v2273_v40 = vadd.f32 %v2085_v62, %v2085_v62 }
  0xcc   : > { %594 = vrot.lane.b32.xlu1 %v1926_v27, %s1733_s22  ;;  %1499 = vpow2.f32 %v650_v45  ;;  %3023 = vst [vmem:[#allocation38_spill] sm:$0xff] %v2243_v44  ;;  %v377_v45 = vmul.f32 %v2229_v51, %v1847_v4  ;;  %3024 = vst [vmem:[#allocation39_spill] sm:$0xff] %v2259_v6  ;;  %v376_v4 = vmul.f32 %v2243_v44, %v1850_v5 }
  0xcd   : > { %592 = vrot.lane.b32.xlu0 %v1912_v24, %s1733_s22  ;;  %v1480_v63 = vpop.eup %1479  ;;  %1501 = vrcp.f32 %v674_v50  ;;  %3025 = vst [vmem:[#allocation40_spill] sm:$0xff] %v2273_v40 }
  0xce   : > { %v1482_v2 = vpop.eup %1481  ;;  %1503 = vpow2.f32 %v648_v59  ;;  %v2247_v37 = vmul.f32 %v1480_v63, %v679_v43  ;;  %v680_v63 = vmul.f32 %v1896_v19, %v2243_v44 }
  0xcf   : > { %v1484_v0 = vpop.eup %1483  ;;  %v2251_v1 = vmul.f32 %v1482_v2, %v374_v13 }
  0xd0   : > { %598 = vrot.lane.b32.xlu1 %v1928_v28, %s1733_s22  ;;  %v1486_v50 = vpop.eup %1485  ;;  %v2253_v59 = vmul.f32 %v1484_v0, %v678_v55 }
  0xd1   : > { %596 = vrot.lane.b32.xlu0 %v1942_v31, %s1733_s22  ;;  %v2263_v35 = vmul.f32 %v1486_v50, %v377_v45  ;;  %v379_v45 = vmul.f32 %v2259_v6, %v1859_v8  ;;  %v656_v31 = vmul.f32 1.442695, %v1910_v23 }
  0xd3   : > { %v1488_v43 = vpop.eup %1487 }
  0xd4   : > { %602 = vrot.lane.b32.xlu1 %v2081_v10, %s1733_s22  ;;  %v1490_v13 = vpop.eup %1489  ;;  %v2275_v2 = vmul.f32 %v1488_v43, %v681_v52  ;;  %v378_v52 = vmul.f32 %v2273_v40, %v1862_v9 }
  0xd5   : > { %600 = vrot.lane.b32.xlu0 %v2092_v33, %s1733_s22  ;;  %v1492_v55 = vpop.eup %1491  ;;  %v2277_v0 = vmul.f32 %v1490_v13, %v376_v4  ;;  %v683_v33 = vmul.f32 %v1907_v22, %v2259_v6  ;;  %v1735_v13 = vmov 0  }
  0xd6   : > { %v2283_v5 = vmul.f32 %v1492_v55, %v680_v63  ;;  %v1494_v50 = vpop.eup %1493  ;;  %1448 = vset.pattern.permute.xlu1 %v1735_v13  ;;  %1447 = vset.pattern.permute.xlu0 %v1735_v13  ;;  %v682_v63 = vmul.f32 %v1910_v23, %v2273_v40 }
  0xd7   : > { %v1496_v62 = vpop.eup %1495  ;;  %v2291_v43 = vmul.f32 %v1494_v50, %v379_v45  ;;  %v2313_v45 = vpop.permute.xlu1 %554 }
  0xd8   : > { %854 = vrot.lane.b32.xlu1 %v2152_v41, %s1733_s22  ;;  %v1498_v4 = vpop.eup %1497  ;;  %v2293_v8 = vmul.f32 %v1496_v62, %v683_v33  ;;  %3026 = vst [vmem:[#allocation41_spill] sm:$0xff] %v2313_v45  ;;  %v2315_v50 = vpop.permute.xlu0 %552 }
  0xd9   : > { %852 = vrot.lane.b32.xlu0 %v2168_v30, %s1733_s22  ;;  %v2295_v41 = vpop.eup %1499  ;;  %v2301_v30 = vmul.f32 %v1498_v4, %v378_v52  ;;  %3027 = vst [vmem:[#allocation42_spill] sm:$0xff] %v2315_v50 }
  0xda   : > { %v1502_v55 = vpop.eup %1501 }
  0xdb   : > { %v2305_v9 = vpop.eup %1503  ;;  %v2307_v33 = vmul.f32 %v1502_v55, %v682_v63  ;;  %v2317_v62 = vpop.permute.xlu1 %558  ;;  %v658_v63 = vmul.f32 1.442695, %v1907_v22 }
  0xdc   : > { %894 = vrot.lane.b32.xlu1 %v2116_v38, %s1733_s22  ;;  %3028 = vst [vmem:[#allocation43_spill] sm:$0xff] %v2317_v62  ;;  %v2319_v52 = vpop.permute.xlu0 %556 }
  0xdd   : > { %892 = vrot.lane.b32.xlu0 %v2132_v47, %s1733_s22  ;;  %3029 = vst [vmem:[#allocation44_spill] sm:$0xff] %v2319_v52  ;;  %1505 = vpow2.f32 %v658_v63 }
  0xde   : > { %1507 = vpow2.f32 %v656_v31 }
  0xe0   : > { %898 = vrot.lane.b32.xlu1 %v2295_v41, %s1733_s22 }
  0xe1   : > { %896 = vrot.lane.b32.xlu0 %v2305_v9, %s1733_s22 }
 0x126   : > { %v439_v4 = vpop.permute.xlu1 %438 }
 0x127   : > { %v461_v13 = vadd.f32 %v439_v4, %v2014_v14  ;;  %v437_v10 = vpop.permute.xlu0 %436 }
 0x128   : > { %v460_v55 = vadd.f32 %v437_v10, %v2044_v57 }
 0x129   : > { %486 = vrot.lane.b32.xlu1 %v461_v13, %s1733_s22 }
 0x12a   : > { %484 = vrot.lane.b32.xlu0 %v460_v55, %s1733_s22  ;;  %v443_v28 = vpop.permute.xlu1 %442  ;;  %v3030_v55 = vld [vmem:[#allocation27_spill] sm:$0xff] }
 0x12b   : > { %v463_v40 = vadd.f32 %v443_v28, %v2073_v54  ;;  %v441_v6 = vpop.permute.xlu0 %440 }
 0x12c   : > { %v462_v52 = vadd.f32 %v441_v6, %v2090_v56 }
 0x12d   : > { %490 = vrot.lane.b32.xlu1 %v463_v40, %s1733_s22  ;;  %v2338_v40 = vpop.eup %1505 }
 0x12e   : > { %488 = vrot.lane.b32.xlu0 %v462_v52, %s1733_s22  ;;  %v447_v14 = vpop.permute.xlu1 %446  ;;  %v2341_v52 = vpop.eup %1507 }
 0x12f   : > { %v465_v57 = vadd.f32 %v447_v14, %v2109_v29  ;;  %v445_v62 = vpop.permute.xlu0 %444 }
 0x130   : > { %v464_v13 = vadd.f32 %v445_v62, %v2130_v36  ;;  %v654_v36 = vmul.f32 1.442695, %v1893_v18 }
 0x131   : > { %494 = vrot.lane.b32.xlu1 %v465_v57, %s1733_s22  ;;  %v765_v57 = vadd.f32 %v3030_v55, %v439_v4 }
 0x132   : > { %492 = vrot.lane.b32.xlu0 %v464_v13, %s1733_s22  ;;  %v451_v31 = vpop.permute.xlu1 %450  ;;  %1509 = vpow2.f32 %v654_v36 }
 0x133   : > { %v467_v54 = vadd.f32 %v451_v31, %v2148_v3  ;;  %v449_v63 = vpop.permute.xlu0 %448  ;;  %v723_v3 = vmul.f32 %v2338_v40, %v1907_v22  ;;  %v3034_v22 = vld [vmem:[#allocation33_spill] sm:$0xff] }
 0x134   : > { %v466_v56 = vadd.f32 %v449_v63, %v2182_v34  ;;  %v652_v34 = vmul.f32 1.442695, %v1896_v19 }
 0x135   : > { %498 = vrot.lane.b32.xlu1 %v467_v54, %s1733_s22  ;;  %v3031_v54 = vld [vmem:[#allocation32_spill] sm:$0xff] }
 0x136   : > { %496 = vrot.lane.b32.xlu0 %v466_v56, %s1733_s22  ;;  %v563_v29 = vpop.permute.xlu1 %562  ;;  %v764_v50 = vadd.f32 %v3031_v54, %v437_v10  ;;  %v722_v56 = vmul.f32 %v2341_v52, %v1910_v23  ;;  %1511 = vpow2.f32 %v652_v34  ;;  %v766_v10 = vadd.f32 %v2098_v11, %v441_v6 }
 0x137   : > { %v579_v13 = vadd.f32 %v563_v29, %v2113_v58  ;;  %v561_v44 = vpop.permute.xlu0 %560  ;;  %v767_v29 = vadd.f32 %v3034_v22, %v443_v28  ;;  %v771_v11 = vadd.f32 %v2158_v39, %v451_v31  ;;  %v1077_v22 = vld [vmem:[%s2927_s1 + $0x8] sm:$0xff] }
 0x138   : > { %v578_v45 = vadd.f32 %v561_v44, %v2121_v61  ;;  %v769_v61 = vadd.f32 %v2126_v60, %v447_v14 }
 0x139   : > { %790 = vrot.lane.b32.xlu1 %v765_v57, %s1733_s22  ;;  %v2354_v24 = vadd.f32 %v723_v3, %v579_v13 }
 0x13a   : > { %788 = vrot.lane.b32.xlu0 %v764_v50, %s1733_s22  ;;  %v591_v58 = vpop.permute.xlu1 %590  ;;  %v2357_v4 = vadd.f32 %v722_v56, %v578_v45  ;;  %v768_v45 = vadd.f32 %v2142_v48, %v445_v62  ;;  %v770_v50 = vadd.f32 %v2194_v49, %v449_v63 }
 0x13b   : > { %3032 = vst [vmem:[#allocation27_spill] sm:$0xff] %v2354_v24  ;;  %v589_v55 = vpop.permute.xlu0 %588  ;;  %v613_v48 = vadd.f32 %v1904_v21, %v591_v58  ;;  %v2403_v58 = vmul.f32 %v2295_v41, %v1883_v16  ;;  %v3058_v24 = vld [vmem:[#allocation14_spill] sm:$0xff] }
 0x13c   : > { %3033 = vst [vmem:[#allocation32_spill] sm:$0xff] %v2357_v4  ;;  %v612_v36 = vadd.f32 %v1898_v20, %v589_v55 }
 0x13d   : > { %794 = vrot.lane.b32.xlu1 %v767_v29, %s1733_s22  ;;  %v733_v21 = vadd.f32 %v2116_v38, %v613_v48  ;;  %v2407_v38 = vmul.f32 %v2305_v9, %v1886_v17  ;;  %v1076_v29 = vld [vmem:[%s2927_s1] sm:$0xff]  ;;  %v1082_v48 = vld [vmem:[%s2927_s1 + $0x30] sm:$0xff] }
 0x13e   : > { %792 = vrot.lane.b32.xlu0 %v766_v10, %s1733_s22  ;;  %v2363_v23 = vpop.permute.xlu1 %594  ;;  %v732_v13 = vadd.f32 %v2132_v47, %v612_v36  ;;  %v1078_v10 = vld [vmem:[%s2927_s1 + $0x10] sm:$0xff]  ;;  %v1083_v36 = vld [vmem:[%s2927_s1 + $0x38] sm:$0xff] }
 0x13f   : > { %v2366_v44 = vpop.permute.xlu0 %592  ;;  %v2384_v14 = vpop.eup %1509 }
 0x140   : > { %v2415_v47 = vmul.f32 %v2384_v14, %v1893_v18 }
 0x141   : > { %798 = vrot.lane.b32.xlu1 %v769_v61, %s1733_s22 }
 0x142   : > { %796 = vrot.lane.b32.xlu0 %v768_v45, %s1733_s22  ;;  %v2371_v28 = vpop.permute.xlu1 %598 }
 0x143   : > { %v2374_v6 = vpop.permute.xlu0 %596  ;;  %v2387_v57 = vpop.eup %1511 }
 0x145   : > { %802 = vrot.lane.b32.xlu1 %v771_v11, %s1733_s22  ;;  %v1080_v11 = vld [vmem:[%s2927_s1 + $0x20] sm:$0xff] }
 0x146   : > { %800 = vrot.lane.b32.xlu0 %v770_v50, %s1733_s22  ;;  %v2379_v60 = vpop.permute.xlu1 %602  ;;  %v1081_v50 = vld [vmem:[%s2927_s1 + $0x28] sm:$0xff] }
 0x147   : > { %v2382_v62 = vpop.permute.xlu0 %600 }
 0x149   : > { %902 = vrot.lane.b32.xlu1 %v2384_v14, %s1733_s22 }
 0x14a   : > { %900 = vrot.lane.b32.xlu0 %v2387_v57, %s1733_s22  ;;  %v855_v39 = vpop.permute.xlu1 %854 }
 0x14b   : > { %v877_v49 = vadd.f32 %v855_v39, %v2177_v15  ;;  %v853_v31 = vpop.permute.xlu0 %852  ;;  %v1132_v39 = vsub.f32 1.0, %v1076_v29 }
 0x14c   : > { %v876_v63 = vadd.f32 %v853_v31, %v2185_v42  ;;  %v2419_v42 = vmul.f32 %v2387_v57, %v1896_v19  ;;  %v1134_v31 = vsub.f32 1.0, %v1078_v10 }
 0x14d   : > { %906 = vrot.lane.b32.xlu1 %v2338_v40, %s1733_s22 }
 0x14e   : > { %904 = vrot.lane.b32.xlu0 %v2341_v52, %s1733_s22  ;;  %v895_v20 = vpop.permute.xlu1 %894 }
 0x14f   : > { %v917_v34 = vadd.f32 %v895_v20, %v733_v21  ;;  %v893_v54 = vpop.permute.xlu0 %892  ;;  %v1138_v20 = vsub.f32 1.0, %v1082_v48 }
 0x150   : > { %v916_v15 = vadd.f32 %v893_v54, %v732_v13  ;;  %v1137_v13 = vsub.f32 1.0, %v1081_v50  ;;  %v398_v54 = vmul.f32 1.442695, %v2154_v25  ;;  %v406_v25 = vmul.f32 1.442695, %v2263_v35 }
 0x151   : > { %1513 = vrcp.f32 %v917_v34  ;;  %858 = vrot.lane.b32.xlu1 %v2403_v58, %s1733_s22  ;;  %v1139_v34 = vsub.f32 1.0, %v1083_v36 }
 0x152   : > { %1515 = vrcp.f32 %v916_v15  ;;  %856 = vrot.lane.b32.xlu0 %v2407_v38, %s1733_s22  ;;  %v3035_v15 = vld [vmem:[#allocation37_spill] sm:$0xff] }
 0x153   : > { %1517 = vpow2.f32 %v398_v54 }
 0x155   : > { %862 = vrot.lane.b32.xlu1 %v2415_v47, %s1733_s22 }
 0x156   : > { %860 = vrot.lane.b32.xlu0 %v2419_v42, %s1733_s22 }
 0x159   : > { %866 = vrot.lane.b32.xlu1 %v723_v3, %s1733_s22  ;;  %v1079_v3 = vld [vmem:[%s2927_s1 + $0x18] sm:$0xff] }
 0x15a   : > { %864 = vrot.lane.b32.xlu0 %v722_v56, %s1733_s22  ;;  %v1135_v21 = vsub.f32 1.0, %v1079_v3  ;;  %s2886_s22 = scalar_lea.vmem %s2928_s2, %s1386_s17 }
 0x15d   : > { %1091 = vperm.xlu1 %1448, %v1077_v22  }
 0x15e   : > { %v1514_v55 = vpop.eup %1513  ;;  %1086 = vperm.xlu0 %1447, %v1076_v29   ;;  %v702_v29 = vmul.f32 1.442695, %v3035_v15  ;;  %v3041_v15 = vld [vmem:[#allocation17_spill] sm:$0xff] }
 0x15f   : > { %v1516_v61 = vpop.eup %1515  ;;  %v2439_v56 = vmul.f32 %v1514_v55, %v877_v49  ;;  %v1133_v49 = vsub.f32 1.0, %v1077_v22  ;;  %v396_v22 = vmul.f32 1.442695, %v2210_v32  ;;  %v700_v55 = vmul.f32 1.442695, %v2223_v7  ;;  %v2466_v32 = vpop.permute.xlu0 %896 }
 0x160   : > { %v2441_v45 = vmul.f32 %v1516_v61, %v876_v63  ;;  %v1136_v63 = vsub.f32 1.0, %v1080_v11  ;;  %1519 = vpow2.f32 %v702_v29  ;;  %v706_v61 = vmul.f32 1.442695, %v2247_v37  ;;  %v2472_v35 = vpop.eup %1517 }
 0x161   : > { %1096 = vperm.xlu1 %1448, %v1078_v10   ;;  %v402_v10 = vmul.f32 1.442695, %v2237_v12  ;;  %1521 = vpow2.f32 %v396_v22  ;;  %v710_v7 = vmul.f32 1.442695, %v2275_v2  ;;  %v404_v12 = vmul.f32 1.442695, %v2277_v0 }
 0x162   : > { %1101 = vperm.xlu0 %1447, %v1079_v3   ;;  %v400_v3 = vmul.f32 1.442695, %v2251_v1  ;;  %1523 = vpow2.f32 %v700_v55  ;;  %v708_v1 = vmul.f32 1.442695, %v2283_v5  ;;  %v408_v2 = vmul.f32 1.442695, %v2301_v30 }
 0x163   : > { %1525 = vpow2.f32 %v402_v10  ;;  %v615_v0 = vadd.f32 %v1926_v27, %v2363_v23  ;;  %v3040_v27 = vld [vmem:[#allocation24_spill] sm:$0xff]  ;;  %v2500_v29 = vmul.f32 %v2203_v46, %v3041_v15  ;;  %v712_v22 = vmul.f32 1.442695, %v2307_v33  ;;  %v3042_v10 = vld [vmem:[#allocation25_spill] sm:$0xff]  ;;  %v3046_v33 = vld [vmem:[#allocation19_spill] sm:$0xff] }
 0x164   : > { %1527 = vpow2.f32 %v706_v61  ;;  %v2496_v23 = vmul.f32 %v2162_v26, %v3040_v27  ;;  %v2507_v61 = vmul.f32 %v2203_v46, %v3042_v10  ;;  %v3047_v46 = vld [vmem:[#allocation8_spill] sm:$0xff]  ;;  %vm965_vm0 = vcmp.ne.f32.partialorder %v2439_v56, %v2439_v56 }
 0x165   : > { %1106 = vperm.xlu1 %1448, %v1080_v11   ;;  %v704_v11 = vmul.f32 1.442695, %v2253_v59  ;;  %1529 = vpow2.f32 %v400_v3  ;;  %v3043_v3 = vld [vmem:[#allocation15_spill] sm:$0xff]  ;;  %v3054_v27 = vld [vmem:[#allocation20_spill] sm:$0xff]  ;;  %vm964_vm1 = vcmp.ne.f32.partialorder %v2441_v45, %v2441_v45 }
 0x166   : > { %1111 = vperm.xlu0 %1447, %v1081_v50   ;;  %v2464_v50 = vpop.permute.xlu1 %898 }
 0x167   : > { %1531 = vpow2.f32 %v704_v11  ;;  %v2511_v11 = vmul.f32 %v2214_v53, %v3043_v3  ;;  %v3066_v3 = vld [vmem:[#allocation40_spill] sm:$0xff] }
 0x168   : > { %1533 = vpow2.f32 %v406_v25 }
 0x169   : > { %1116 = vperm.xlu1 %1448, %v1082_v48   ;;  %v410_v48 = vmul.f32 1.442695, %v2291_v43 }
 0x16a   : > { %1121 = vperm.xlu0 %1447, %v1083_v36   ;;  %v714_v36 = vmul.f32 1.442695, %v2293_v8 }
 0x16d   : > { %1142 = vperm.xlu1 %1448, %v1132_v39   ;;  %v2475_v39 = vpop.eup %1519 }
 0x16e   : > { %1147 = vperm.xlu0 %1447, %v1133_v49   ;;  %v2480_v49 = vpop.eup %1521 }
 0x171   : > { %1152 = vperm.xlu1 %1448, %v1134_v31   ;;  %v2482_v31 = vpop.eup %1523 }
 0x172   : > { %1157 = vperm.xlu0 %1447, %v1135_v21   ;;  %v3036_v21 = vld [vmem:[#allocation18_spill] sm:$0xff]  ;;  %v2492_v54 = vpop.eup %1525 }
 0x173   : > { %v2503_v55 = vpop.eup %1527 }
 0x175   : > { %1162 = vperm.xlu1 %1448, %v1136_v63   ;;  %v3037_v63 = vld [vmem:[#allocation36_spill] sm:$0xff] }
 0x176   : > { %1167 = vperm.xlu0 %1447, %v1137_v13   ;;  %v469_v13 = vmul.f32 %v3037_v63, %v3036_v21 }
 0x179   : > { %1172 = vperm.xlu1 %1448, %v1138_v20   ;;  %v3038_v20 = vld [vmem:[#allocation23_spill] sm:$0xff] }
 0x17a   : > { %1177 = vperm.xlu0 %1447, %v1139_v34   ;;  %v2488_v8 = vmul.f32 %v3037_v63, %v3038_v20  ;;  %v3039_v34 = vld [vmem:[#allocation16_spill] sm:$0xff]  ;;  %v3053_v63 = vld [vmem:[#allocation42_spill] sm:$0xff] }
 0x17b   : > { %v468_v30 = vmul.f32 %v2162_v26, %v3039_v34  ;;  %v735_v26 = vadd.f32 %v2295_v41, %v615_v0  ;;  %v3050_v0 = vld [vmem:[#allocation10_spill] sm:$0xff] }
 0x17c   : > { %v3055_v20 = vld [vmem:[#allocation38_spill] sm:$0xff] }
 0x19b   : > { %v487_v37 = vpop.permute.xlu1 %486 }
 0x19c   : > { %1535 = vrcp.f32 %v487_v37  ;;  %v485_v59 = vpop.permute.xlu0 %484 }
 0x19d   : > { %1537 = vrcp.f32 %v485_v59  ;;  %v614_v59 = vadd.f32 %v3047_v46, %v2366_v44  ;;  %v2540_v44 = vmul.f32 %v3055_v20, %v3054_v27  ;;  %v3057_v46 = vld [vmem:[#allocation43_spill] sm:$0xff] }
 0x19e   : > { %1539 = vpow2.f32 %v710_v7  ;;  %v2514_v7 = vpop.eup %1529 }
 0x19f   : > { %1541 = vpow2.f32 %v404_v12  ;;  %v491_v5 = vpop.permute.xlu1 %490  ;;  %v3044_v12 = vld [vmem:[#allocation26_spill] sm:$0xff] }
 0x1a0   : > { %1543 = vpow2.f32 %v708_v1  ;;  %v489_v43 = vpop.permute.xlu0 %488  ;;  %v2518_v37 = vmul.f32 %v2214_v53, %v3044_v12  ;;  %v2522_v1 = vmul.f32 %v2229_v51, %v3046_v33  ;;  %v3052_v53 = vld [vmem:[#allocation11_spill] sm:$0xff]  ;;  %v3059_v33 = vld [vmem:[#allocation44_spill] sm:$0xff] }
 0x1a1   : > { %1545 = vpow2.f32 %v410_v48  ;;  %v574_v12 = vadd.f32 %v3053_v63, %v3052_v53  ;;  %v3064_v63 = vld [vmem:[#allocation30_spill] sm:$0xff] }
 0x1a2   : > { %1547 = vrcp.f32 %v491_v5  ;;  %3045 = vst [vmem:[#allocation33_spill] sm:$0xff] %v2518_v37  ;;  %v3051_v5 = vld [vmem:[#allocation41_spill] sm:$0xff]  ;;  %v919_v37 = vadd.f32 %v2464_v50, %v735_v26 }
 0x1a3   : > { %1549 = vrcp.f32 %v489_v43  ;;  %v495_v25 = vpop.permute.xlu1 %494  ;;  %v575_v43 = vadd.f32 %v3051_v5, %v3050_v0  ;;  %v3062_v5 = vld [vmem:[#allocation21_spill] sm:$0xff]  ;;  %v2574_v26 = vadd.f32 %v2407_v38, %v574_v12  ;;  %v3071_v12 = vld [vmem:[#allocation6_spill] sm:$0xff] }
 0x1a4   : > { %1551 = vpow2.f32 %v714_v36  ;;  %v493_v48 = vpop.permute.xlu0 %492  ;;  %v2526_v36 = vpop.eup %1531 }
 0x1a5   : > { %1553 = vpow2.f32 %v408_v2  ;;  %v3048_v2 = vld [vmem:[#allocation28_spill] sm:$0xff]  ;;  %v2536_v10 = vpop.eup %1533  ;;  %v2571_v50 = vadd.f32 %v2403_v58, %v575_v43 }
 0x1a6   : > { %1555 = vrcp.f32 %v495_v25  ;;  %v2530_v41 = vmul.f32 %v2229_v51, %v3048_v2  ;;  %v3056_v25 = vld [vmem:[#allocation13_spill] sm:$0xff]  ;;  %v576_v51 = vadd.f32 %v3059_v33, %v3058_v24 }
 0x1a7   : > { %1557 = vrcp.f32 %v493_v48  ;;  %v577_v4 = vadd.f32 %v3057_v46, %v3056_v25  ;;  %v3063_v48 = vld [vmem:[#allocation39_spill] sm:$0xff]  ;;  %v3065_v46 = vld [vmem:[#allocation22_spill] sm:$0xff] }
 0x1a8   : > { %3049 = vst [vmem:[#allocation37_spill] sm:$0xff] %v2530_v41  ;;  %1559 = vpow2.f32 %v712_v22  ;;  %v3060_v41 = vld [vmem:[#allocation29_spill] sm:$0xff]  ;;  %v2552_v53 = vmul.f32 %v3063_v48, %v3062_v5  ;;  %v2556_v27 = vmul.f32 %v3063_v48, %v3064_v63  ;;  %v2561_v24 = vmul.f32 %v3066_v3, %v3065_v46  ;;  %v3067_v22 = vld [vmem:[#allocation31_spill] sm:$0xff]  ;;  %v499_v5 = vpop.permute.xlu1 %498  ;;  %v497_v48 = vpop.permute.xlu0 %496 }
 0x1a9   : > { %v1536_v2 = vpop.eup %1535  ;;  %v2548_v0 = vmul.f32 %v3055_v20, %v3060_v41  ;;  %v2565_v33 = vmul.f32 %v3066_v3, %v3067_v22  ;;  %v734_v20 = vadd.f32 %v2305_v9, %v614_v59  ;;  %1561 = vrcp.f32 %v499_v5  ;;  %v3070_v59 = vld [vmem:[#allocation5_spill] sm:$0xff]  ;;  %v1646_v22 = vld [vmem:[%s1820_s19 + $0x70] sm:$0xff] }
 0x1aa   : > { %v1538_v25 = vpop.eup %1537  ;;  %v511_v41 = vmul.f32 %v1536_v2, %v469_v13  ;;  %1563 = vrcp.f32 %v497_v48  ;;  %v2579_v9 = vadd.f32 %v2415_v47, %v577_v4  ;;  %v2582_v13 = vadd.f32 %v2419_v42, %v576_v51  ;;  %v1641_v42 = vld [vmem:[%s1820_s19] sm:$0xff] }
 0x1ab   : > { %3061 = vst [vmem:[#allocation18_spill] sm:$0xff] %v2548_v0  ;;  %v2568_v0 = vpop.eup %1539  ;;  %v509_v15 = vmul.f32 %v1538_v25, %v468_v30  ;;  %1565 = vrcp.f32 %v919_v37  ;;  %v2588_v38 = vmul.f32 %v2472_v35, %v3070_v59  ;;  %v2592_v2 = vmul.f32 %v2475_v39, %v3071_v12  ;;  %v1642_v25 = vld [vmem:[%s1820_s19 + $0x20] sm:$0xff]  ;;  %v1643_v59 = vld [vmem:[%s1820_s19 + $0x30] sm:$0xff] }
 0x1ac   : > { %3068 = vst [vmem:[#allocation36_spill] sm:$0xff] %v2568_v0  ;;  %v2576_v63 = vpop.eup %1541  ;;  %v526_v3 = vmul.f32 1.442695, %v511_v41  ;;  %3069 = vst [vmem:[#allocation16_spill] sm:$0xff] %v2582_v13  ;;  %v918_v4 = vadd.f32 %v2466_v32, %v734_v20  ;;  %v791_v47 = vpop.permute.xlu1 %790  ;;  %v2599_v37 = vmul.f32 %v1641_v42, %v2480_v49  ;;  %v2607_v48 = vmul.f32 %v1642_v25, %v2514_v7  ;;  %v1644_v42 = vld [vmem:[%s1820_s19 + $0x50] sm:$0xff] }
 0x1ad   : > { %v2584_v30 = vpop.eup %1543  ;;  %v524_v58 = vmul.f32 1.442695, %v509_v15  ;;  %v3073_v15 = vld [vmem:[#allocation7_spill] sm:$0xff]  ;;  %v789_v5 = vpop.permute.xlu0 %788  ;;  %v2611_v32 = vmul.f32 %v1643_v59, %v2492_v54  ;;  %v2615_v20 = vmul.f32 %v2503_v55, %v1883_v16  ;;  %v2631_v16 = vmul.f32 %v2568_v0, %v1893_v18 }
 0x1ae   : > { %v2594_v41 = vpop.eup %1545  ;;  %1567 = vpow2.f32 %v526_v3  ;;  %v2603_v43 = vmul.f32 %v2482_v31, %v3073_v15  ;;  %v2624_v15 = vmul.f32 %v1644_v42, %v2536_v10 }
 0x1af   : > { %3072 = vst [vmem:[#allocation8_spill] sm:$0xff] %v2594_v41  ;;  %v1548_v51 = vpop.eup %1547  ;;  %1569 = vpow2.f32 %v524_v58  ;;  %v2620_v58 = vmul.f32 %v2526_v36, %v1886_v17  ;;  %3075 = vst [vmem:[#allocation41_spill] sm:$0xff] %v2631_v16 }
 0x1b0   : > { %v1550_v3 = vpop.eup %1549  ;;  %v515_v12 = vmul.f32 %v1548_v51, %v2500_v29  ;;  %1571 = vrcp.f32 %v791_v47  ;;  %v795_v47 = vpop.permute.xlu1 %794  ;;  %v1645_v51 = vld [vmem:[%s1820_s19 + $0x40] sm:$0xff] }
 0x1b1   : > { %v2626_v25 = vpop.eup %1551  ;;  %v513_v59 = vmul.f32 %v1550_v3, %v2511_v11  ;;  %1573 = vrcp.f32 %v789_v5  ;;  %v2639_v42 = vmul.f32 %v1645_v51, %v2576_v63  ;;  %v793_v18 = vpop.permute.xlu0 %792  ;;  %v2645_v3 = vmul.f32 %v2584_v30, %v1896_v19  ;;  %v3077_v51 = vld [vmem:[#allocation9_spill] sm:$0xff]  ;;  %v3078_v19 = vld [vmem:[#allocation12_spill] sm:$0xff] }
 0x1b2   : > { %3074 = vst [vmem:[#allocation10_spill] sm:$0xff] %v2626_v25  ;;  %v2635_v29 = vpop.eup %1553  ;;  %1575 = vrcp.f32 %v918_v4  ;;  %v530_v17 = vmul.f32 1.442695, %v515_v12  ;;  %v2649_v4 = vmul.f32 %v1646_v22, %v2594_v41  ;;  %v617_v0 = vadd.f32 %v3077_v51, %v2371_v28  ;;  %v1647_v51 = vld [vmem:[%s1820_s19 + $0x78] sm:$0xff] }
 0x1b3   : > { %v1556_v11 = vpop.eup %1555  ;;  %v528_v5 = vmul.f32 1.442695, %v513_v59  ;;  %1577 = vrcp.f32 %v795_v47  ;;  %v973_v59 = vsel %vm965_vm0, 0.0, %v2439_v56  ;;  %v616_v13 = vadd.f32 %v3078_v19, %v2374_v6  ;;  %v3080_v6 = vld [vmem:[#allocation35_spill] sm:$0xff] }
 0x1b4   : > { %3076 = vst [vmem:[#allocation11_spill] sm:$0xff] %v2649_v4  ;;  %v1558_v12 = vpop.eup %1557  ;;  %1579 = vpow2.f32 %v530_v17  ;;  %v519_v16 = vmul.f32 %v1556_v11, %v2522_v1  ;;  %v972_v28 = vsel %vm964_vm1, 0.0, %v2441_v45  ;;  %v3079_v1 = vld [vmem:[#allocation34_spill] sm:$0xff]  ;;  %v799_v56 = vpop.permute.xlu1 %798  ;;  %v2671_v41 = vmul.f32 %v1647_v51, %v2626_v25  ;;  %v1648_v45 = vld [vmem:[%s1820_s19 + $0x60] sm:$0xff] }
 0x1b5   : > { %v2658_v47 = vpop.eup %1559  ;;  %1581 = vpow2.f32 %v528_v5  ;;  %v517_v22 = vmul.f32 %v1558_v12, %v2540_v44  ;;  %v619_v17 = vadd.f32 %v3079_v1, %v2379_v60  ;;  %v618_v5 = vadd.f32 %v3080_v6, %v2382_v62  ;;  %v797_v12 = vpop.permute.xlu0 %796  ;;  %v1649_v60 = vld [vmem:[%s1820_s19 + $0x68] sm:$0xff] }
 0x1b6   : > { %v534_v11 = vmul.f32 1.442695, %v519_v16  ;;  %1583 = vrcp.f32 %v793_v18  ;;  %vm981_vm2 = vcmp.eq.f32.partialorder %v973_v59, inf  ;;  %v1562_v19 = vpop.eup %1561  ;;  %v2677_v4 = vmul.f32 %v1648_v45, %v2635_v29 }
 0x1b7   : > { %v532_v44 = vmul.f32 1.442695, %v517_v22  ;;  %1585 = vrcp.f32 %v799_v56  ;;  %v2681_v16 = vmul.f32 %v1649_v60, %v2658_v47  ;;  %vm980_vm3 = vcmp.eq.f32.partialorder %v972_v28, inf  ;;  %v1564_v18 = vpop.eup %1563 }
 0x1b8   : > { %1587 = vpow2.f32 %v534_v11  ;;  %v523_v1 = vmul.f32 %v1562_v19, %v2552_v53  ;;  %v737_v62 = vadd.f32 %v2384_v14, %v617_v0  ;;  %v736_v22 = vadd.f32 %v2387_v57, %v616_v13  ;;  %v2686_v56 = vpop.eup %1565  ;;  %v803_v51 = vpop.permute.xlu1 %802 }
 0x1b9   : > { %1589 = vpow2.f32 %v532_v44  ;;  %v521_v11 = vmul.f32 %v1564_v18, %v2561_v24  ;;  %v739_v6 = vadd.f32 %v2338_v40, %v619_v17  ;;  %v989_v45 = vsel %vm981_vm2, 3.4028235e+38, %v973_v59  ;;  %v801_v44 = vpop.permute.xlu0 %800 }
 0x1ba   : > { %1591 = vrcp.f32 %v797_v12  ;;  %v538_v25 = vmul.f32 1.442695, %v523_v1  ;;  %v738_v53 = vadd.f32 %v2341_v52, %v618_v5  ;;  %v2693_v14 = vsel %vm980_vm3, 3.4028235e+38, %v972_v28 }
 0x1bb   : > { %v1568_v60 = vpop.eup %1567  ;;  %1593 = vrcp.f32 %v803_v51  ;;  %v536_v0 = vmul.f32 1.442695, %v521_v11  ;;  %vm997_vm4 = vcmp.eq.f32.partialorder %v989_v45, -inf  ;;  %vm996_vm5 = vcmp.eq.f32.partialorder %v2693_v14, -inf }
 0x1bc   : > { %v1570_v57 = vpop.eup %1569  ;;  %1595 = vrcp.f32 %v801_v44  ;;  %v621_v24 = vmul.f32 %v1568_v60, %v3036_v21  ;;  %v637_v13 = vadd.f32 %v1568_v60, %v2472_v35  ;;  %v903_v28 = vpop.permute.xlu1 %902 }
 0x1bd   : > { %v1572_v12 = vpop.eup %1571  ;;  %1597 = vpow2.f32 %v538_v25  ;;  %v620_v40 = vmul.f32 %v1570_v57, %v3039_v34  ;;  %v636_v59 = vadd.f32 %v1570_v57, %v2480_v49  ;;  %v921_v25 = vadd.f32 %v903_v28, %v737_v62  ;;  %v901_v18 = vpop.permute.xlu0 %900  ;;  %v3081_v62 = vld [vmem:[#allocation17_spill] sm:$0xff] }
 0x1be   : > { %v1574_v17 = vpop.eup %1573  ;;  %1599 = vpow2.f32 %v536_v0  ;;  %v815_v52 = vmul.f32 %v1572_v12, %v2488_v8  ;;  %v629_v5 = vadd.f32 %v621_v24, %v2588_v38  ;;  %v2702_v19 = vadd.f32 %v2475_v39, %v637_v13 }
 0x1bf   : > { %v2704_v21 = vpop.eup %1575  ;;  %v813_v35 = vmul.f32 %v1574_v17, %v2496_v23  ;;  %v628_v34 = vadd.f32 %v620_v40, %v2599_v37  ;;  %v2709_v49 = vadd.f32 %v2482_v31, %v636_v59  ;;  %v920_v8 = vadd.f32 %v901_v18, %v736_v22 }
 0x1c0   : > { %v1578_v1 = vpop.eup %1577  ;;  %v830_v11 = vmul.f32 1.442695, %v815_v52  ;;  %v2712_v51 = vadd.f32 %v2592_v2, %v629_v5  ;;  %1601 = vrcp.f32 %v921_v25  ;;  %v907_v31 = vpop.permute.xlu1 %906  ;;  %v2722_v2 = vsel %vm997_vm4, -3.4028235e+38, %v989_v45 }
 0x1c1   : > { %v1580_v39 = vpop.eup %1579  ;;  %v828_v38 = vmul.f32 1.442695, %v813_v35  ;;  %v819_v60 = vmul.f32 %v1578_v1, %v2507_v61  ;;  %v2717_v23 = vadd.f32 %v2603_v43, %v628_v34  ;;  %v923_v24 = vadd.f32 %v907_v31, %v739_v6  ;;  %v905_v13 = vpop.permute.xlu0 %904  ;;  %v3082_v61 = vld [vmem:[#allocation15_spill] sm:$0xff]  ;;  %v3083_v43 = vld [vmem:[#allocation33_spill] sm:$0xff] }
 0x1c2   : > { %v1582_v37 = vpop.eup %1581  ;;  %1603 = vpow2.f32 %v830_v11  ;;  %v623_v44 = vmul.f32 %v1580_v39, %v3081_v62  ;;  %v639_v22 = vadd.f32 %v1580_v39, %v2492_v54  ;;  %v922_v17 = vadd.f32 %v905_v13, %v738_v53  ;;  %v3084_v54 = vld [vmem:[#allocation37_spill] sm:$0xff]  ;;  %v3085_v39 = vld [vmem:[#allocation18_spill] sm:$0xff] }
 0x1c3   : > { %v1584_v57 = vpop.eup %1583  ;;  %1605 = vpow2.f32 %v828_v38  ;;  %v834_v0 = vmul.f32 1.442695, %v819_v60  ;;  %v622_v12 = vmul.f32 %v1582_v37, %v3082_v61  ;;  %v638_v52 = vadd.f32 %v1582_v37, %v2514_v7 }
 0x1c4   : > { %v1586_v40 = vpop.eup %1585  ;;  %v817_v59 = vmul.f32 %v1584_v57, %v3083_v43  ;;  %1607 = vrcp.f32 %v920_v8  ;;  %v631_v35 = vadd.f32 %v623_v44, %v2611_v32  ;;  %v859_v18 = vpop.permute.xlu1 %858  ;;  %v2734_v1 = vadd.f32 %v2503_v55, %v639_v22 }
 0x1c5   : > { %v1588_v28 = vpop.eup %1587  ;;  %1609 = vpow2.f32 %v834_v0  ;;  %v823_v5 = vmul.f32 %v1586_v40, %v3084_v54  ;;  %v630_v45 = vadd.f32 %v622_v12, %v2607_v48  ;;  %v2731_v34 = vadd.f32 %v2526_v36, %v638_v52  ;;  %v857_v8 = vpop.permute.xlu0 %856  ;;  %v3088_v54 = vld [vmem:[#allocation21_spill] sm:$0xff] }
 0x1c6   : > { %v1590_v25 = vpop.eup %1589  ;;  %v832_v6 = vmul.f32 1.442695, %v817_v59  ;;  %1611 = vrcp.f32 %v923_v24  ;;  %v879_v11 = vadd.f32 %v859_v18, %v2571_v50  ;;  %v878_v60 = vadd.f32 %v857_v8, %v2574_v26  ;;  %v3086_v50 = vld [vmem:[#allocation20_spill] sm:$0xff] }
 0x1c7   : > { %v1592_v53 = vpop.eup %1591  ;;  %v838_v7 = vmul.f32 1.442695, %v823_v5  ;;  %1613 = vrcp.f32 %v922_v17  ;;  %v2738_v48 = vadd.f32 %v2620_v58, %v630_v45  ;;  %v2743_v36 = vadd.f32 %v2615_v20, %v631_v35  ;;  %v3090_v35 = vld [vmem:[#allocation27_spill] sm:$0xff] }
 0x1c8   : > { %v1594_v32 = vpop.eup %1593  ;;  %1615 = vpow2.f32 %v832_v6  ;;  %v821_v38 = vmul.f32 %v1592_v53, %v3085_v39  ;;  %v2747_v31 = vmul.f32 %v2686_v56, %v879_v11  ;;  %v624_v62 = vmul.f32 %v1590_v25, %v3086_v50  ;;  %v863_v0 = vpop.permute.xlu1 %862  ;;  %v3091_v6 = vld [vmem:[#allocation41_spill] sm:$0xff]  ;;  %v3094_v11 = vld [vmem:[#allocation23_spill] sm:$0xff]  ;;  %v3095_v39 = vld [vmem:[#allocation24_spill] sm:$0xff] }
 0x1c9   : > { %v1596_v55 = vpop.eup %1595  ;;  %1617 = vpow2.f32 %v838_v7  ;;  %v827_v37 = vmul.f32 %v1594_v32, %v2556_v27  ;;  %v953_v57 = vmul.f32 %v2704_v21, %v878_v60  ;;  %v640_v26 = vadd.f32 %v1590_v25, %v2576_v63  ;;  %v861_v13 = vpop.permute.xlu0 %860  ;;  %v3087_v27 = vld [vmem:[#allocation19_spill] sm:$0xff] }
 0x1ca   : > { %v1598_v58 = vpop.eup %1597  ;;  %v836_v44 = vmul.f32 1.442695, %v821_v38  ;;  %v825_v22 = vmul.f32 %v1596_v55, %v2565_v33  ;;  %v632_v61 = vadd.f32 %v624_v62, %v2639_v42  ;;  %v625_v12 = vmul.f32 %v1588_v28, %v3087_v27 }
 0x1cb   : > { %v1600_v20 = vpop.eup %1599  ;;  %v842_v24 = vmul.f32 1.442695, %v827_v37  ;;  %v2758_v56 = vsel %vm996_vm5, -3.4028235e+38, %v2693_v14  ;;  %v881_v33 = vadd.f32 %v863_v0, %v2579_v9  ;;  %v2762_v21 = vadd.f32 %v2584_v30, %v640_v26  ;;  %v3089_v30 = vld [vmem:[#allocation16_spill] sm:$0xff]  ;;  %v3096_v37 = vld [vmem:[#allocation11_spill] sm:$0xff] }
 0x1cc   : > { %1619 = vpow2.f32 %v836_v44  ;;  %v840_v40 = vmul.f32 1.442695, %v825_v22  ;;  %v2765_v63 = vadd.f32 %v2645_v3, %v632_v61  ;;  %v633_v42 = vadd.f32 %v625_v12, %v2624_v15  ;;  %v867_v17 = vpop.permute.xlu1 %866  ;;  %v3092_v15 = vld [vmem:[#allocation36_spill] sm:$0xff]  ;;  %v3097_v26 = vld [vmem:[#allocation25_spill] sm:$0xff] }
 0x1cd   : > { %1621 = vpow2.f32 %v842_v24  ;;  %v641_v43 = vadd.f32 %v1588_v28, %v2536_v10  ;;  %v1602_v59 = vpop.eup %1601  ;;  %v626_v14 = vmul.f32 %v1600_v20, %v3065_v46  ;;  %v642_v52 = vadd.f32 %v1600_v20, %v2635_v29  ;;  %v865_v3 = vpop.permute.xlu0 %864  ;;  %v3093_v28 = vld [vmem:[#allocation32_spill] sm:$0xff] }
 0x1ce   : > { %1623 = vpow2.f32 %v840_v40  ;;  %v627_v9 = vmul.f32 %v1598_v58, %v3088_v54  ;;  %v880_v45 = vadd.f32 %v861_v13, %v3089_v30  ;;  %v883_v25 = vadd.f32 %v867_v17, %v3090_v35  ;;  %v3098_v13 = vld [vmem:[#allocation8_spill] sm:$0xff]  ;;  %v3100_v17 = vld [vmem:[#allocation10_spill] sm:$0xff] }
 0x1cf   : > { %v1604_v5 = vpop.eup %1603  ;;  %v753_v18 = vadd.f32 %v3091_v6, %v633_v42  ;;  %v761_v53 = vadd.f32 %v3092_v15, %v641_v43  ;;  %v882_v7 = vadd.f32 %v865_v3, %v3093_v28  ;;  %v634_v29 = vadd.f32 %v626_v14, %v2677_v4  ;;  %v3099_v42 = vld [vmem:[#allocation26_spill] sm:$0xff] }
 0x1d0   : > { %v1606_v10 = vpop.eup %1605  ;;  %v925_v8 = vmul.f32 %v1604_v5, %v3094_v11  ;;  %v941_v46 = vadd.f32 %v1604_v5, %v2702_v19  ;;  %v762_v55 = vadd.f32 %v2658_v47, %v642_v52  ;;  %v635_v50 = vadd.f32 %v627_v9, %v3096_v37  ;;  %v3101_v52 = vld [vmem:[#allocation28_spill] sm:$0xff] }
 0x1d1   : > { %v1608_v32 = vpop.eup %1607  ;;  %v924_v38 = vmul.f32 %v1606_v10, %v3095_v39  ;;  %v940_v60 = vadd.f32 %v1606_v10, %v2709_v49  ;;  %v754_v0 = vadd.f32 %v2681_v16, %v634_v29  ;;  %v643_v61 = vadd.f32 %v1598_v58, %v3098_v13  ;;  %v3104_v10 = vld [vmem:[#allocation31_spill] sm:$0xff] }
 0x1d2   : > { %v1610_v62 = vpop.eup %1609  ;;  %v957_v44 = vmul.f32 %v1608_v32, %v880_v45  ;;  %v2785_v22 = vadd.f32 %v925_v8, %v2712_v51  ;;  %1625 = vrcp.f32 %v941_v46  ;;  %v755_v51 = vadd.f32 %v2671_v41, %v635_v50  ;;  %v3102_v45 = vld [vmem:[#allocation29_spill] sm:$0xff] }
 0x1d3   : > { %v1612_v19 = vpop.eup %1611  ;;  %v2789_v4 = vadd.f32 %v924_v38, %v2717_v23  ;;  %1627 = vrcp.f32 %v940_v60  ;;  %v927_v20 = vmul.f32 %v1610_v62, %v3097_v26  ;;  %v943_v49 = vadd.f32 %v1610_v62, %v2734_v1 }
 0x1d4   : > { %v1614_v47 = vpop.eup %1613  ;;  %v2793_v24 = vmul.f32 %v1612_v19, %v883_v25  ;;  %vm966_vm6 = vcmp.ne.f32.partialorder %v953_v57, %v953_v57  ;;  %v763_v14 = vadd.f32 %v3100_v17, %v643_v61  ;;  %vm967_vm8 = vcmp.ne.f32.partialorder %v2747_v31, %v2747_v31 }
 0x1d5   : > { %v1616_v27 = vpop.eup %1615  ;;  %v961_v12 = vmul.f32 %v1614_v47, %v882_v7  ;;  %v2798_v16 = vadd.f32 %v927_v20, %v2743_v36  ;;  %1629 = vrcp.f32 %v943_v49  ;;  %v974_v23 = vsel %vm966_vm6, 0.0, %v953_v57 }
 0x1d6   : > { %v1618_v40 = vpop.eup %1617  ;;  %v926_v43 = vmul.f32 %v1616_v27, %v3099_v42  ;;  %v942_v1 = vadd.f32 %v1616_v27, %v2731_v34  ;;  %vm982_vm7 = vcmp.eq.f32.partialorder %v974_v23, inf  ;;  %v959_v9 = vmul.f32 %v1602_v59, %v881_v33 }
 0x1d7   : > { %v929_v58 = vmul.f32 %v1618_v40, %v3101_v52  ;;  %v945_v54 = vadd.f32 %v1618_v40, %v761_v53  ;;  %v990_v41 = vsel %vm982_vm7, 3.4028235e+38, %v974_v23  ;;  %v975_v57 = vsel %vm967_vm8, 0.0, %v2747_v31 }
 0x1d8   : > { %v2807_v36 = vadd.f32 %v926_v43, %v2738_v48  ;;  %1631 = vrcp.f32 %v942_v1  ;;  %vm998_vm9 = vcmp.eq.f32.partialorder %v990_v41, -inf  ;;  %vm983_vm10 = vcmp.eq.f32.partialorder %v975_v57, inf  ;;  %v2814_v59 = vpop.permute.xlu1 %1091  ;;  %v3103_v48 = vld [vmem:[#allocation30_spill] sm:$0xff] }
 0x1d9   : > { %v1620_v5 = vpop.eup %1619  ;;  %v2810_v30 = vadd.f32 %v929_v58, %v753_v18  ;;  %1633 = vrcp.f32 %v945_v54  ;;  %v991_v3 = vsel %vm983_vm10, 3.4028235e+38, %v975_v57  ;;  %vm968_vm11 = vcmp.ne.f32.partialorder %v957_v44, %v957_v44  ;;  %v2817_v18 = vpop.permute.xlu0 %1086 }
 0x1da   : > { %v1622_v34 = vpop.eup %1621  ;;  %v928_v35 = vmul.f32 %v1620_v5, %v3102_v45  ;;  %v944_v25 = vadd.f32 %v1620_v5, %v2762_v21  ;;  %vm999_vm12 = vcmp.eq.f32.partialorder %v991_v3, -inf  ;;  %v976_v31 = vsel %vm968_vm11, 0.0, %v957_v44 }
 0x1db   : > { %v1624_v33 = vpop.eup %1623  ;;  %v931_v6 = vmul.f32 %v1622_v34, %v3103_v48  ;;  %v947_v15 = vadd.f32 %v1622_v34, %v763_v14  ;;  %v2826_v11 = vsel %vm998_vm9, -3.4028235e+38, %v990_v41  ;;  %vm984_vm13 = vcmp.eq.f32.partialorder %v976_v31, inf }
 0x1dc   : > { %v2820_v53 = vadd.f32 %v928_v35, %v2765_v63  ;;  %1635 = vrcp.f32 %v944_v25  ;;  %v930_v28 = vmul.f32 %v1624_v33, %v3104_v10  ;;  %v946_v7 = vadd.f32 %v1624_v33, %v762_v55  ;;  %v2830_v32 = vpop.permute.xlu1 %1096 }
 0x1dd   : > { %v2823_v21 = vadd.f32 %v931_v6, %v755_v51  ;;  %1637 = vrcp.f32 %v947_v15  ;;  %v992_v46 = vsel %vm984_vm13, 3.4028235e+38, %v976_v31  ;;  %vm969_vm14 = vcmp.ne.f32.partialorder %v959_v9, %v959_v9  ;;  %v2838_v55 = vpop.permute.xlu0 %1101 }
 0x1de   : > { %v2828_v8 = vadd.f32 %v930_v28, %v754_v0  ;;  %1639 = vrcp.f32 %v946_v7  ;;  %v2833_v63 = vsel %vm999_vm12, -3.4028235e+38, %v991_v3  ;;  %v977_v39 = vsel %vm969_vm14, 0.0, %v959_v9 }
 0x1df   : > { %v1626_v29 = vpop.eup %1625  ;;  %vm970_vm15 = vcmp.ne.f32.partialorder %v961_v12, %v961_v12  ;;  %vm971_vm0 = vcmp.ne.f32.partialorder %v2793_v24, %v2793_v24  ;;  %vm1000_vm1 = vcmp.eq.f32.partialorder %v992_v46, -inf  ;;  %vm985_vm2 = vcmp.eq.f32.partialorder %v977_v39, inf }
 0x1e0   : > { %v1628_v38 = vpop.eup %1627  ;;  %v1015_v60 = vmul.f32 %v1626_v29, %v2785_v22  ;;  %v978_v37 = vsel %vm970_vm15, 0.0, %v961_v12  ;;  %v993_v62 = vsel %vm985_vm2, 3.4028235e+38, %v977_v39  ;;  %v979_v44 = vsel %vm971_vm0, 0.0, %v2793_v24  ;;  %v2843_v20 = vpop.permute.xlu1 %1106 }
 0x1e1   : > { %v1013_v50 = vmul.f32 %v1628_v38, %v2789_v4  ;;  %vm986_vm3 = vcmp.eq.f32.partialorder %v978_v37, inf  ;;  %vm1001_vm5 = vcmp.eq.f32.partialorder %v993_v62, -inf  ;;  %vm987_vm6 = vcmp.eq.f32.partialorder %v979_v44, inf  ;;  %v2848_v47 = vpop.permute.xlu0 %1111 }
 0x1e2   : > { %v1630_v0 = vpop.eup %1629  ;;  %vm1029_vm4 = vcmp.ne.f32.partialorder %v1015_v60, %v1015_v60  ;;  %v994_v19 = vsel %vm986_vm3, 3.4028235e+38, %v978_v37  ;;  %v2846_v49 = vsel %vm1000_vm1, -3.4028235e+38, %v992_v46  ;;  %v2850_v13 = vsel %vm1001_vm5, -3.4028235e+38, %v993_v62 }
 0x1e3   : > { %v1037_v26 = vsel %vm1029_vm4, 0.0, %v1015_v60  ;;  %vm1028_vm7 = vcmp.ne.f32.partialorder %v1013_v50, %v1013_v50  ;;  %v1019_v22 = vmul.f32 %v1630_v0, %v2798_v16  ;;  %vm1002_vm9 = vcmp.eq.f32.partialorder %v994_v19, -inf }
 0x1e4   : > { %vm1045_vm8 = vcmp.eq.f32.partialorder %v1037_v26, inf  ;;  %v1036_v4 = vsel %vm1028_vm7, 0.0, %v1013_v50  ;;  %v2852_v51 = vsel %vm987_vm6, 3.4028235e+38, %v979_v44  ;;  %v1117_v43 = vpop.permute.xlu1 %1116  ;;  %v2859_v52 = vsel %vm1002_vm9, -3.4028235e+38, %v994_v19 }
 0x1e5   : > { %v1632_v24 = vpop.eup %1631  ;;  %v1053_v61 = vsel %vm1045_vm8, 3.4028235e+38, %v1037_v26  ;;  %vm1044_vm10 = vcmp.eq.f32.partialorder %v1036_v4, inf  ;;  %vm1031_vm11 = vcmp.ne.f32.partialorder %v1019_v22, %v1019_v22  ;;  %v2856_v14 = vpop.permute.xlu0 %1121 }
 0x1e6   : > { %v1634_v27 = vpop.eup %1633  ;;  %vm1061_vm12 = vcmp.eq.f32.partialorder %v1053_v61, -inf  ;;  %v1052_v12 = vsel %vm1044_vm10, 3.4028235e+38, %v1036_v4  ;;  %v1017_v16 = vmul.f32 %v1632_v24, %v2807_v36  ;;  %v1039_v23 = vsel %vm1031_vm11, 0.0, %v1019_v22 }
 0x1e7   : > { %v1069_v40 = vsel %vm1061_vm12, -3.4028235e+38, %v1053_v61  ;;  %vm1060_vm13 = vcmp.eq.f32.partialorder %v1052_v12, -inf  ;;  %vm1047_vm14 = vcmp.eq.f32.partialorder %v1039_v23, inf  ;;  %v1023_v42 = vmul.f32 %v1634_v27, %v2810_v30 }
 0x1e8   : > { %v1068_v1 = vsel %vm1060_vm13, -3.4028235e+38, %v1052_v12  ;;  %vm1030_vm15 = vcmp.ne.f32.partialorder %v1017_v16, %v1017_v16  ;;  %v1055_v17 = vsel %vm1047_vm14, 3.4028235e+38, %v1039_v23  ;;  %v1125_v54 = vmul.f32 %v2814_v59, %v1069_v40  ;;  %v1143_v25 = vpop.permute.xlu1 %1142 }
 0x1e9   : > { %v1636_v58 = vpop.eup %1635  ;;  %v1038_v41 = vsel %vm1030_vm15, 0.0, %v1017_v16  ;;  %vm1063_vm0 = vcmp.eq.f32.partialorder %v1055_v17, -inf  ;;  %vm1033_vm1 = vcmp.ne.f32.partialorder %v1023_v42, %v1023_v42  ;;  %v1124_v36 = vmul.f32 %v2817_v18, %v1068_v1  ;;  %v1148_v59 = vpop.permute.xlu0 %1147 }
 0x1ea   : > { %v1638_v9 = vpop.eup %1637  ;;  %vm1046_vm2 = vcmp.eq.f32.partialorder %v1038_v41, inf  ;;  %v1021_v57 = vmul.f32 %v1636_v58, %v2820_v53  ;;  %v1041_v5 = vsel %vm1033_vm1, 0.0, %v1023_v42  ;;  %v1071_v45 = vsel %vm1063_vm0, -3.4028235e+38, %v1055_v17 }
 0x1eb   : > { %v1640_v30 = vpop.eup %1639  ;;  %v1054_v34 = vsel %vm1046_vm2, 3.4028235e+38, %v1038_v41  ;;  %vm1049_vm3 = vcmp.eq.f32.partialorder %v1041_v5, inf  ;;  %v1027_v35 = vmul.f32 %v1638_v9, %v2823_v21  ;;  %v1127_v31 = vmul.f32 %v2838_v55, %v1071_v45 }
 0x1ec   : > { %vm1062_vm4 = vcmp.eq.f32.partialorder %v1054_v34, -inf  ;;  %vm1032_vm5 = vcmp.ne.f32.partialorder %v1021_v57, %v1021_v57  ;;  %v1057_v3 = vsel %vm1049_vm3, 3.4028235e+38, %v1041_v5  ;;  %v1025_v33 = vmul.f32 %v1640_v30, %v2828_v8  ;;  %v1153_v7 = vpop.permute.xlu1 %1152 }
 0x1ed   : > { %v1070_v48 = vsel %vm1062_vm4, -3.4028235e+38, %v1054_v34  ;;  %v1040_v6 = vsel %vm1032_vm5, 0.0, %v1021_v57  ;;  %vm1065_vm6 = vcmp.eq.f32.partialorder %v1057_v3, -inf  ;;  %vm1035_vm7 = vcmp.ne.f32.partialorder %v1027_v35, %v1027_v35  ;;  %v1158_v8 = vpop.permute.xlu0 %1157 }
 0x1ee   : > { %v1126_v15 = vmul.f32 %v2830_v32, %v1070_v48  ;;  %vm1048_vm8 = vcmp.eq.f32.partialorder %v1040_v6, inf  ;;  %vm1034_vm9 = vcmp.ne.f32.partialorder %v1025_v33, %v1025_v33  ;;  %v1073_v53 = vsel %vm1065_vm6, -3.4028235e+38, %v1057_v3 }
 0x1ef   : > { %v1056_v18 = vsel %vm1048_vm8, 3.4028235e+38, %v1040_v6  ;;  %v1042_v10 = vsel %vm1034_vm9, 0.0, %v1025_v33  ;;  %v1043_v28 = vsel %vm1035_vm7, 0.0, %v1027_v35  ;;  %vm1244_vm10 = vcmask 31744  }
 0x1f0   : > { %vm1064_vm11 = vcmp.eq.f32.partialorder %v1056_v18, -inf  ;;  %vm1050_vm12 = vcmp.eq.f32.partialorder %v1042_v10, inf  ;;  %vm1051_vm13 = vcmp.eq.f32.partialorder %v1043_v28, inf  ;;  %v1180_v21 = vmul.f32 %v1143_v25, %v2758_v56  ;;  %v1163_v44 = vpop.permute.xlu1 %1162 }
 0x1f1   : > { %v1072_v46 = vsel %vm1064_vm11, -3.4028235e+38, %v1056_v18  ;;  %v1058_v29 = vsel %vm1050_vm12, 3.4028235e+38, %v1042_v10  ;;  %v1059_v32 = vsel %vm1051_vm13, 3.4028235e+38, %v1043_v28  ;;  %v1181_v39 = vmul.f32 %v1148_v59, %v2722_v2  ;;  %v1168_v26 = vpop.permute.xlu0 %1167 }
 0x1f2   : > { %v1129_v38 = vmul.f32 %v2848_v47, %v1073_v53  ;;  %vm1066_vm14 = vcmp.eq.f32.partialorder %v1058_v29, -inf  ;;  %vm1067_vm15 = vcmp.eq.f32.partialorder %v1059_v32, -inf  ;;  %v1188_v60 = vadd.f32 %v1180_v21, %v1124_v36 }
 0x1f3   : > { %v1128_v55 = vmul.f32 %v2843_v20, %v1072_v46  ;;  %v1074_v37 = vsel %vm1066_vm14, -3.4028235e+38, %v1058_v29  ;;  %v1189_v50 = vadd.f32 %v1181_v39, %v1125_v54  ;;  %v1182_v62 = vmul.f32 %v1153_v7, %v2826_v11 }
 0x1f4   : > { %v1130_v56 = vmul.f32 %v1117_v43, %v1074_v37  ;;  %v1075_v0 = vsel %vm1067_vm15, -3.4028235e+38, %v1059_v32  ;;  %vm1196_vm0 = vcmp.ne.f32.partialorder %v1188_v60, %v1188_v60  ;;  %v1183_v19 = vmul.f32 %v1158_v8, %v2833_v63 }
 0x1f5   : > { %v1204_v2 = vsel %vm1196_vm0, 0.0, %v1188_v60  ;;  %vm1197_vm1 = vcmp.ne.f32.partialorder %v1189_v50, %v1189_v50  ;;  %v1190_v22 = vadd.f32 %v1182_v62, %v1126_v15  ;;  %v1184_v4 = vmul.f32 %v1163_v44, %v2846_v49  ;;  %v1178_v58 = vpop.permute.xlu0 %1177 }
 0x1f6   : > { %vm1212_vm2 = vcmp.eq.f32.partialorder %v1204_v2, inf  ;;  %v1205_v47 = vsel %vm1197_vm1, 0.0, %v1189_v50  ;;  %v1191_v20 = vadd.f32 %v1183_v19, %v1127_v31  ;;  %v1185_v24 = vmul.f32 %v1168_v26, %v2850_v13  ;;  %v1173_v13 = vpop.permute.xlu1 %1172 }
 0x1f7   : > { %v1220_v11 = vsel %vm1212_vm2, 3.4028235e+38, %v1204_v2  ;;  %vm1213_vm3 = vcmp.eq.f32.partialorder %v1205_v47, inf  ;;  %vm1198_vm4 = vcmp.ne.f32.partialorder %v1190_v22, %v1190_v22  ;;  %v1192_v63 = vadd.f32 %v1184_v4, %v1128_v55 }
 0x1f8   : > { %vm1228_vm5 = vcmp.eq.f32.partialorder %v1220_v11, -inf  ;;  %v1221_v61 = vsel %vm1213_vm3, 3.4028235e+38, %v1205_v47  ;;  %v1206_v27 = vsel %vm1198_vm4, 0.0, %v1190_v22  ;;  %vm1199_vm6 = vcmp.ne.f32.partialorder %v1191_v20, %v1191_v20 }
 0x1f9   : > { %v1236_v49 = vsel %vm1228_vm5, -3.4028235e+38, %v1220_v11  ;;  %vm1229_vm7 = vcmp.eq.f32.partialorder %v1221_v61, -inf  ;;  %vm1214_vm8 = vcmp.eq.f32.partialorder %v1206_v27, inf  ;;  %v1207_v12 = vsel %vm1199_vm6, 0.0, %v1191_v20 }
 0x1fa   : > { %1245 = vst.msk [vmem:[%s2886_s22] sm:$0xff] %vm1244_vm10, %v1236_v49  ;;  %v1237_v16 = vsel %vm1229_vm7, -3.4028235e+38, %v1221_v61  ;;  %v1222_v23 = vsel %vm1214_vm8, 3.4028235e+38, %v1206_v27  ;;  %vm1215_vm9 = vcmp.eq.f32.partialorder %v1207_v12, inf  ;;  %vm1200_vm11 = vcmp.ne.f32.partialorder %v1192_v63, %v1192_v63 }
 0x1fb   : > { %1246 = vst.msk [vmem:[%s2886_s22 + $0x8] sm:$0xff] %vm1244_vm10, %v1237_v16  ;;  %vm1230_vm12 = vcmp.eq.f32.partialorder %v1222_v23, -inf  ;;  %v1223_v40 = vsel %vm1215_vm9, 3.4028235e+38, %v1207_v12  ;;  %v1208_v42 = vsel %vm1200_vm11, 0.0, %v1192_v63  ;;  %v1193_v43 = vadd.f32 %v1185_v24, %v1129_v38 }
 0x1fc   : > { %v1238_v1 = vsel %vm1230_vm12, -3.4028235e+38, %v1222_v23  ;;  %vm1231_vm13 = vcmp.eq.f32.partialorder %v1223_v40, -inf  ;;  %vm1216_vm14 = vcmp.eq.f32.partialorder %v1208_v42, inf  ;;  %v1186_v17 = vmul.f32 %v1173_v13, %v2859_v52 }
 0x1fd   : > { %1247 = vst.msk [vmem:[%s2886_s22 + $0x10] sm:$0xff] %vm1244_vm10, %v1238_v1  ;;  %v1239_v54 = vsel %vm1231_vm13, -3.4028235e+38, %v1223_v40  ;;  %v1224_v41 = vsel %vm1216_vm14, 3.4028235e+38, %v1208_v42  ;;  %vm1201_vm15 = vcmp.ne.f32.partialorder %v1193_v43, %v1193_v43  ;;  %vm1003_vm0 = vcmp.eq.f32.partialorder %v2852_v51, -inf }
 0x1fe   : > { %1248 = vst.msk [vmem:[%s2886_s22 + $0x18] sm:$0xff] %vm1244_vm10, %v1239_v54  ;;  %vm1232_vm1 = vcmp.eq.f32.partialorder %v1224_v41, -inf  ;;  %v1209_v9 = vsel %vm1201_vm15, 0.0, %v1193_v43  ;;  %v1194_v36 = vadd.f32 %v1186_v17, %v1130_v56  ;;  %v1011_v57 = vsel %vm1003_vm0, -3.4028235e+38, %v2852_v51 }
 0x1ff   : > { %v1131_v5 = vmul.f32 %v2856_v14, %v1075_v0  ;;  %v1240_v52 = vsel %vm1232_vm1, -3.4028235e+38, %v1224_v41  ;;  %vm1217_vm2 = vcmp.eq.f32.partialorder %v1209_v9, inf  ;;  %v1187_v30 = vmul.f32 %v1178_v58, %v1011_v57 }
 0x200   : > { %1249 = vst.msk [vmem:[%s2886_s22 + $0x20] sm:$0xff] %vm1244_vm10, %v1240_v52  ;;  %v1225_v34 = vsel %vm1217_vm2, 3.4028235e+38, %v1209_v9  ;;  %vm1202_vm3 = vcmp.ne.f32.partialorder %v1194_v36, %v1194_v36 }
 0x201   : > { %vm1233_vm4 = vcmp.eq.f32.partialorder %v1225_v34, -inf  ;;  %v1210_v45 = vsel %vm1202_vm3, 0.0, %v1194_v36  ;;  %v1195_v35 = vadd.f32 %v1187_v30, %v1131_v5 }
 0x202   : > { %v1241_v25 = vsel %vm1233_vm4, -3.4028235e+38, %v1225_v34  ;;  %vm1218_vm5 = vcmp.eq.f32.partialorder %v1210_v45, inf }
 0x203   : > { %1250 = vst.msk [vmem:[%s2886_s22 + $0x28] sm:$0xff] %vm1244_vm10, %v1241_v25  ;;  %v1226_v3 = vsel %vm1218_vm5, 3.4028235e+38, %v1210_v45  ;;  %vm1203_vm6 = vcmp.ne.f32.partialorder %v1195_v35, %v1195_v35 }
 0x204   : > { %vm1234_vm7 = vcmp.eq.f32.partialorder %v1226_v3, -inf  ;;  %v1211_v51 = vsel %vm1203_vm6, 0.0, %v1195_v35 }
 0x205   : > { %v1242_v14 = vsel %vm1234_vm7, -3.4028235e+38, %v1226_v3  ;;  %vm1219_vm8 = vcmp.eq.f32.partialorder %v1211_v51, inf }
 0x206   : > { %1251 = vst.msk [vmem:[%s2886_s22 + $0x30] sm:$0xff] %vm1244_vm10, %v1242_v14  ;;  %v1227_v33 = vsel %vm1219_vm8, 3.4028235e+38, %v1211_v51 }
 0x207   : > { %vm1235_vm9 = vcmp.eq.f32.partialorder %v1227_v33, -inf }
 0x208   : > { %v1243_v59 = vsel %vm1235_vm9, -3.4028235e+38, %v1227_v33 }
 0x209   : > { %1252 = vst.msk [vmem:[%s2886_s22 + $0x38] sm:$0xff] %vm1244_vm10, %v1243_v59 }
 0x20a PF: > { %s15_s14 = sadd.s32 1, %s1728_s14   ;;  %s3105_s9 = smov %s1712_s10 }
 0x20b   : > { %p12_p8 = scmp.ge.s32.totalorder %s15_s14, 4   ;;  %s3106_s10 = smov %s1716_s11 }
 0x20c   : > { %s3107_s11 = smov %s1800_s21  ;;  %s3108_s12 = smov %s1724_s13 }
 0x20d   : > { %s3109_s13 = smov %s3111_s16  ;;  %14 = sbr.rel (!%p12_p8) target bundleno = 4 (0x4), region = 72 }
 0x212   :  { %1283 = vsyncpa [#allocation3], 1 }
 0x213   :  { %1285 = vsyncpa [#allocation3 + $0x1], 1 }

</bundles_post_ra>
